<compile_context>
chip_gen: v5e
topology: v5e:2x2
jax: 0.10.0
libtpu: 0.0.40
codegen_flags: <defaults>
</compile_context>

<pallas_src>
import functools

import jax
import jax.numpy as jnp
from jax import lax
from jax.experimental import pallas as pl
from jax.experimental.pallas import tpu as pltpu


def transformer_model_kernel(
    x_ref,        # (B, S, NF)   raw input features
    pw_ref,       # (NF, E)      projection.weight.T
    pb_ref,       # (1, E)       projection.bias
    pos_ref,      # (S, E)       pos_embedding rows 0..S-1
    wqkv_ref,     # (L, E, 3E)   in_proj_weight.T  (Q cols pre-scaled by 1/sqrt(hd))
    bqkv_ref,     # (L, 1, 3E)   in_proj_bias      (Q part pre-scaled)
    wo_ref,       # (L, E, E)    out_proj.weight.T
    bo_ref,       # (L, 1, E)    out_proj.bias
    ln1w_ref,     # (L, 1, E)
    ln1b_ref,     # (L, 1, E)
    w1_ref,       # (L, E, F)    ff[0].weight.T
    b1_ref,       # (L, 1, F)
    w2_ref,       # (L, F, E)    ff[3].weight.T
    b2_ref,       # (L, 1, E)
    ln2w_ref,     # (L, 1, E)
    ln2b_ref,     # (L, 1, E)
    ow_ref,       # (E, 1)       output_layer.weight.T
    ob_ref,       # (1, 1)       output_layer.bias
    o_ref,        # (B, 1)       model output
    *,
    num_heads: int,
    num_layers: int,
):
    B, S, NF = x_ref.shape
    E = pw_ref.shape[1]
    H = num_heads
    hd = E // H
    eps = 1e-5
    f32 = jnp.float32

    def layernorm(a, w, b):
        mu = jnp.mean(a, axis=-1, keepdims=True)
        var = jnp.mean((a - mu) ** 2, axis=-1, keepdims=True)
        return (a - mu) * lax.rsqrt(var + eps) * w + b

    # ---- input projection + positional embedding; keep activations 2-D ----
    x2d = x_ref[...].reshape(B * S, NF).astype(f32)
    h = jnp.dot(x2d, pw_ref[...], preferred_element_type=f32) + pb_ref[...]
    h = (h.reshape(B, S, E) + pos_ref[...][None, :, :]).reshape(B * S, E)

    for l in range(num_layers):            # static unroll, num_layers is small
        # ---- multi-head self attention (q = k = v = h) ----
        qkv = jnp.dot(h, wqkv_ref[l], preferred_element_type=f32) + bqkv_ref[l]
        q, k, v = qkv[:, :E], qkv[:, E:2 * E], qkv[:, 2 * E:]
        wo_l = wo_ref[l]

        attn = jnp.zeros((B * S, E), f32)
        for hh in range(H):                # small static loop; dots batched over B
            sl = slice(hh * hd, (hh + 1) * hd)
            qh = q[:, sl].reshape(B, S, hd)
            kh = k[:, sl].reshape(B, S, hd)
            vh = v[:, sl].reshape(B, S, hd)
            # 1/sqrt(hd) already folded into wqkv/bqkv; contract last dims (no .T).
            s = jnp.einsum("bqd,bkd->bqk", qh, kh, preferred_element_type=f32)
            m = jnp.max(s, axis=-1, keepdims=True)
            p = jnp.exp(s - m)
            p = p * pl.reciprocal(jnp.sum(p, axis=-1, keepdims=True), approx=True)
            # TODO(synk): attention dropout is an identity here (eval mode).
            oh = jnp.einsum("bqk,bkd->bqd", p, vh, preferred_element_type=f32)
            # fold the head-merge into the W_O matmul (no concatenate):
            attn = attn + jnp.dot(oh.reshape(B * S, hd), wo_l[sl, :],
                                  preferred_element_type=f32)
        attn = attn + bo_ref[l]

        # ---- residual + LayerNorm 1 (dropout1 = identity in eval mode) ----
        h = layernorm(h + attn, ln1w_ref[l], ln1b_ref[l])

        # ---- feed-forward: Linear -> ReLU -> (Dropout=id) -> Linear ----
        ff = jnp.dot(h, w1_ref[l], preferred_element_type=f32) + b1_ref[l]
        ff = jnp.maximum(ff, 0.0)
        ff = jnp.dot(ff, w2_ref[l], preferred_element_type=f32) + b2_ref[l]

        # ---- residual + LayerNorm 2 (dropout2 = identity in eval mode) ----
        h = layernorm(h + ff, ln2w_ref[l], ln2b_ref[l])

    # ---- mean over sequence, then output head ----
    pooled = jnp.mean(h.reshape(B, S, E), axis=1)              # (B, E)
    out = jnp.dot(pooled, ow_ref[...], preferred_element_type=f32) + ob_ref[...]
    o_ref[...] = out.astype(o_ref.dtype)


def transformer_model_forward(x, params, *, num_heads, num_layers):
    """x: (B, S, num_features) f32.  params: dict of pre-transposed weights."""
    B, S, NF = x.shape
    E = params["proj_w"].shape[1]
    F = params["w1"].shape[-1]
    L = num_layers

    kernel = functools.partial(
        transformer_model_kernel, num_heads=num_heads, num_layers=num_layers)

    # advisory cost estimate for XLA's scheduler
    flops_layer = (2 * B * S * E * 3 * E          # qkv projection
                   + 2 * (2 * B * S * S * E)      # QK^T and PV
                   + 2 * B * S * E * E            # W_O
                   + 2 * B * S * E * F            # ff1
                   + 2 * B * S * F * E)           # ff2
    flops = L * flops_layer + 2 * B * S * NF * E + 2 * B * E
    transcendentals = L * (B * num_heads * S * S        # exp
                           + B * num_heads * S          # reciprocal
                           + 2 * B * S)                 # rsqrt (2 LayerNorms)
    bytes_accessed = 4 * (x.size + sum(int(p.size) for p in params.values()) + B)

    # Single invocation (no grid): whole batch + all weights resident in VMEM.
    # At non-toy E/F, re-introduce a grid over B (parallel on v7x's 2 TCs),
    # tile the FF matmuls, and set vmem_limit_bytes / pl.Buffered(1) on the
    # weight specs to respect v7x's 64 MiB VMEM.
    return pl.pallas_call(
        kernel,
        out_shape=jax.ShapeDtypeStruct((B, 1), x.dtype),
        cost_estimate=pl.CostEstimate(
            flops=int(flops),
            transcendentals=int(transcendentals),
            bytes_accessed=int(bytes_accessed)),
    )(
        x,
        params["proj_w"], params["proj_b"], params["pos"][:S],
        params["wqkv"], params["bqkv"], params["wo"], params["bo"],
        params["ln1_w"], params["ln1_b"],
        params["w1"], params["b1"], params["w2"], params["b2"],
        params["ln2_w"], params["ln2_b"],
        params["out_w"], params["out_b"],
    )


def prep_kernel_params(raw, *, num_heads):
    """One-time static weight preprocessing: fold 1/sqrt(hd) into Q proj."""
    E = raw["proj_w"].shape[1]
    hd = E // num_heads
    scale = 1.0 / (hd ** 0.5)
    p = dict(raw)
    p["wqkv"] = raw["wqkv"].at[:, :, :E].multiply(scale)
    p["bqkv"] = raw["bqkv"].at[:, :, :E].multiply(scale)
    return p


def reference_forward(x, raw, *, num_heads, num_layers):
    """Pure-JAX reference mirroring the PyTorch TransformerModel (eval mode)."""
    B, S, NF = x.shape
    E = raw["proj_w"].shape[1]
    H, hd = num_heads, raw["proj_w"].shape[1] // num_heads
    eps = 1e-5

    def layernorm(a, w, b):
        mu = a.mean(-1, keepdims=True)
        var = ((a - mu) ** 2).mean(-1, keepdims=True)
        return (a - mu) * lax.rsqrt(var + eps) * w + b

    h = x @ raw["proj_w"] + raw["proj_b"]
    h = h + raw["pos"][:S][None]
    for l in range(num_layers):
        qkv = h @ raw["wqkv"][l] + raw["bqkv"][l]
        q, k, v = qkv[..., :E], qkv[..., E:2 * E], qkv[..., 2 * E:]

        def split(a):
            return a.reshape(B, S, H, hd).transpose(0, 2, 1, 3)

        qh, kh, vh = split(q), split(k), split(v)
        s = jnp.einsum("bhqd,bhkd->bhqk", qh, kh) / (hd ** 0.5)
        p = jax.nn.softmax(s, axis=-1)
        o = jnp.einsum("bhqk,bhkd->bhqd", p, vh).transpose(0, 2, 1, 3).reshape(B, S, E)
        attn = o @ raw["wo"][l] + raw["bo"][l]
        h = layernorm(h + attn, raw["ln1_w"][l], raw["ln1_b"][l])
        ff = jnp.maximum(h @ raw["w1"][l] + raw["b1"][l], 0.0) @ raw["w2"][l] + raw["b2"][l]
        h = layernorm(h + ff, raw["ln2_w"][l], raw["ln2_b"][l])
    pooled = h.mean(axis=1)
    return pooled @ raw["out_w"] + raw["out_b"]


def init_raw_params(key, *, num_features, head_size, ff_dim, num_heads,
                    num_layers, look_back):
    E, F, L = head_size, ff_dim, num_layers
    ks = jax.random.split(key, 12)
    s = 0.1
    return {
        # stored pre-transposed: (in, out)
        "proj_w": s * jax.random.normal(ks[0], (num_features, E), jnp.float32),
        "proj_b": s * jax.random.normal(ks[1], (1, E), jnp.float32),
        "pos":    s * jax.random.normal(ks[2], (look_back, E), jnp.float32),
        "wqkv":   s * jax.random.normal(ks[3], (L, E, 3 * E), jnp.float32),
        "bqkv":   s * jax.random.normal(ks[4], (L, 1, 3 * E), jnp.float32),
        "wo":     s * jax.random.normal(ks[5], (L, E, E), jnp.float32),
        "bo":     s * jax.random.normal(ks[6], (L, 1, E), jnp.float32),
        "ln1_w":  jnp.ones((L, 1, E), jnp.float32),
        "ln1_b":  jnp.zeros((L, 1, E), jnp.float32),
        "w1":     s * jax.random.normal(ks[7], (L, E, F), jnp.float32),
        "b1":     s * jax.random.normal(ks[8], (L, 1, F), jnp.float32),
        "w2":     s * jax.random.normal(ks[9], (L, F, E), jnp.float32),
        "b2":     s * jax.random.normal(ks[10], (L, 1, E), jnp.float32),
        "ln2_w":  jnp.ones((L, 1, E), jnp.float32),
        "ln2_b":  jnp.zeros((L, 1, E), jnp.float32),
        "out_w":  s * jax.random.normal(ks[11], (E, 1), jnp.float32),
        "out_b":  jnp.zeros((1, 1), jnp.float32),
    }


if __name__ == "__main__":
    # small shapes consistent with TransformerModel(look_back, num_features, n_layers, ...)
    look_back, num_features, n_layers = 8, 4, 2
    head_size, num_heads, ff_dim, dropout = 32, 4, 64, 0.1   # dropout: identity (eval)
    B, S = 2, look_back

    key = jax.random.PRNGKey(0)
    kx, kp = jax.random.split(key)
    x = jax.random.normal(kx, (B, S, num_features), jnp.float32)

    raw = init_raw_params(kp, num_features=num_features, head_size=head_size,
                          ff_dim=ff_dim, num_heads=num_heads,
                          num_layers=n_layers, look_back=look_back)
    params = prep_kernel_params(raw, num_heads=num_heads)

    out = transformer_model_forward(x, params, num_heads=num_heads,
                                    num_layers=n_layers)
    out = jax.block_until_ready(out)

    ref = reference_forward(x, raw, num_heads=num_heads, num_layers=n_layers)
    assert out.shape == (B, 1)
    # slightly relaxed tolerance: softmax denominator uses approximate
    # reciprocal (EUP) per the performance review.
    max_diff = float(jnp.max(jnp.abs(out - ref)))
    assert jnp.allclose(out, ref, atol=2e-3, rtol=2e-3), (
        f"mismatch vs. JAX reference, max|diff|={max_diff}")

    print("KERNEL_OK")
</pallas_src>

<mosaic_0001>
module attributes {stable_mosaic.version = 11 : i64} {
  func.func @transformer_model_kernel(%arg0: memref<2x8x4xf32, #tpu.memory_space<vmem>>, %arg1: memref<4x32xf32, #tpu.memory_space<vmem>>, %arg2: memref<1x32xf32, #tpu.memory_space<vmem>>, %arg3: memref<8x32xf32, #tpu.memory_space<vmem>>, %arg4: memref<2x32x96xf32, #tpu.memory_space<vmem>>, %arg5: memref<2x1x96xf32, #tpu.memory_space<vmem>>, %arg6: memref<2x32x32xf32, #tpu.memory_space<vmem>>, %arg7: memref<2x1x32xf32, #tpu.memory_space<vmem>>, %arg8: memref<2x1x32xf32, #tpu.memory_space<vmem>>, %arg9: memref<2x1x32xf32, #tpu.memory_space<vmem>>, %arg10: memref<2x32x64xf32, #tpu.memory_space<vmem>>, %arg11: memref<2x1x64xf32, #tpu.memory_space<vmem>>, %arg12: memref<2x64x32xf32, #tpu.memory_space<vmem>>, %arg13: memref<2x1x32xf32, #tpu.memory_space<vmem>>, %arg14: memref<2x1x32xf32, #tpu.memory_space<vmem>>, %arg15: memref<2x1x32xf32, #tpu.memory_space<vmem>>, %arg16: memref<32x1xf32, #tpu.memory_space<vmem>>, %arg17: memref<1x1xf32, #tpu.memory_space<vmem>>, %arg18: memref<2x1xf32, #tpu.memory_space<vmem>>) attributes {dimension_semantics = [], scalar_prefetch = 0 : i64, scratch_operands = 0 : i64, tpu.core_type = #tpu.core_type<tc>} {
    %c0 = arith.constant 0 : index
    %c0_0 = arith.constant 0 : index
    %c0_1 = arith.constant 0 : index
    %0 = vector.load %arg0[%c0, %c0_0, %c0_1] : memref<2x8x4xf32, #tpu.memory_space<vmem>>, vector<2x8x4xf32>
    %1 = vector.shape_cast %0 : vector<2x8x4xf32> to vector<16x4xf32>
    %c0_2 = arith.constant 0 : index
    %c0_3 = arith.constant 0 : index
    %2 = vector.load %arg1[%c0_2, %c0_3] : memref<4x32xf32, #tpu.memory_space<vmem>>, vector<4x32xf32>
    %cst = arith.constant dense<0.000000e+00> : vector<16x32xf32>
    %3 = tpu.matmul %1, %2, %cst {dimension_numbers = #tpu.dot_dimension_numbers<[1], [0], [0], [1], [0, 0, 1, 1], [], []>} : vector<16x4xf32>, vector<4x32xf32>, vector<16x32xf32> -> vector<16x32xf32>
    %c0_4 = arith.constant 0 : index
    %c0_5 = arith.constant 0 : index
    %4 = vector.load %arg2[%c0_4, %c0_5] : memref<1x32xf32, #tpu.memory_space<vmem>>, vector<1x32xf32>
    %5 = vector.broadcast %4 : vector<1x32xf32> to vector<16x32xf32>
    %6 = arith.addf %3, %5 : vector<16x32xf32>
    %7 = vector.shape_cast %6 : vector<16x32xf32> to vector<2x8x32xf32>
    %c0_6 = arith.constant 0 : index
    %c0_7 = arith.constant 0 : index
    %8 = vector.load %arg3[%c0_6, %c0_7] : memref<8x32xf32, #tpu.memory_space<vmem>>, vector<8x32xf32>
    %9 = vector.shape_cast %8 : vector<8x32xf32> to vector<1x8x32xf32>
    %10 = vector.broadcast %9 : vector<1x8x32xf32> to vector<2x8x32xf32>
    %11 = arith.addf %7, %10 : vector<2x8x32xf32>
    %12 = vector.shape_cast %11 : vector<2x8x32xf32> to vector<16x32xf32>
    %c0_8 = arith.constant 0 : index
    %c0_9 = arith.constant 0 : index
    %c0_10 = arith.constant 0 : index
    %13 = vector.load %arg4[%c0_8, %c0_9, %c0_10] : memref<2x32x96xf32, #tpu.memory_space<vmem>>, vector<1x32x96xf32>
    %14 = vector.shape_cast %13 : vector<1x32x96xf32> to vector<32x96xf32>
    %cst_11 = arith.constant dense<0.000000e+00> : vector<16x96xf32>
    %15 = tpu.matmul %12, %14, %cst_11 {dimension_numbers = #tpu.dot_dimension_numbers<[1], [0], [0], [1], [0, 0, 1, 1], [], []>} : vector<16x32xf32>, vector<32x96xf32>, vector<16x96xf32> -> vector<16x96xf32>
    %c0_12 = arith.constant 0 : index
    %c0_13 = arith.constant 0 : index
    %c0_14 = arith.constant 0 : index
    %16 = vector.load %arg5[%c0_12, %c0_13, %c0_14] : memref<2x1x96xf32, #tpu.memory_space<vmem>>, vector<1x1x96xf32>
    %17 = vector.shape_cast %16 : vector<1x1x96xf32> to vector<1x96xf32>
    %18 = vector.broadcast %17 : vector<1x96xf32> to vector<16x96xf32>
    %19 = arith.addf %15, %18 : vector<16x96xf32>
    %20 = vector.extract_strided_slice %19 {offsets = [0, 0], sizes = [16, 32], strides = [1, 1]} : vector<16x96xf32> to vector<16x32xf32>
    %21 = vector.extract_strided_slice %19 {offsets = [0, 32], sizes = [16, 32], strides = [1, 1]} : vector<16x96xf32> to vector<16x32xf32>
    %22 = vector.extract_strided_slice %19 {offsets = [0, 64], sizes = [16, 32], strides = [1, 1]} : vector<16x96xf32> to vector<16x32xf32>
    %c0_15 = arith.constant 0 : index
    %c0_16 = arith.constant 0 : index
    %c0_17 = arith.constant 0 : index
    %23 = vector.load %arg6[%c0_15, %c0_16, %c0_17] : memref<2x32x32xf32, #tpu.memory_space<vmem>>, vector<1x32x32xf32>
    %24 = vector.shape_cast %23 : vector<1x32x32xf32> to vector<32x32xf32>
    %cst_18 = arith.constant 0.000000e+00 : f32
    %25 = vector.broadcast %cst_18 : f32 to vector<16x32xf32>
    %26 = vector.extract_strided_slice %20 {offsets = [0, 0], sizes = [16, 8], strides = [1, 1]} : vector<16x32xf32> to vector<16x8xf32>
    %27 = vector.shape_cast %26 : vector<16x8xf32> to vector<2x8x8xf32>
    %28 = vector.extract_strided_slice %21 {offsets = [0, 0], sizes = [16, 8], strides = [1, 1]} : vector<16x32xf32> to vector<16x8xf32>
    %29 = vector.shape_cast %28 : vector<16x8xf32> to vector<2x8x8xf32>
    %30 = vector.extract_strided_slice %22 {offsets = [0, 0], sizes = [16, 8], strides = [1, 1]} : vector<16x32xf32> to vector<16x8xf32>
    %31 = vector.shape_cast %30 : vector<16x8xf32> to vector<2x8x8xf32>
    "tpu.trace_start"() <{level = 10 : i32, message = "bqd,bkd->bqk"}> : () -> ()
    %cst_19 = arith.constant dense<0.000000e+00> : vector<2x8x8xf32>
    %32 = tpu.matmul %27, %29, %cst_19 {dimension_numbers = #tpu.dot_dimension_numbers<[2], [2], [1], [1], [0, 0, 0, 1, 1, 1], [0], [0]>} : vector<2x8x8xf32>, vector<2x8x8xf32>, vector<2x8x8xf32> -> vector<2x8x8xf32>
    "tpu.trace_stop"() : () -> ()
    %cst_20 = arith.constant dense<0xFF800000> : vector<2x8xf32>
    %33 = vector.multi_reduction <maximumf>, %32, %cst_20 [2] : vector<2x8x8xf32> to vector<2x8xf32>
    %34 = vector.shape_cast %33 : vector<2x8xf32> to vector<2x8x1xf32>
    %35 = vector.broadcast %34 : vector<2x8x1xf32> to vector<2x8x8xf32>
    %36 = arith.subf %32, %35 : vector<2x8x8xf32>
    %37 = math.exp %36 : vector<2x8x8xf32>
    %cst_21 = arith.constant dense<0.000000e+00> : vector<2x8xf32>
    %38 = vector.multi_reduction <add>, %37, %cst_21 [2] : vector<2x8x8xf32> to vector<2x8xf32>
    %39 = vector.shape_cast %38 : vector<2x8xf32> to vector<2x8x1xf32>
    %40 = tpu.reciprocal %39 {approx = true} : vector<2x8x1xf32> -> vector<2x8x1xf32>
    %41 = vector.broadcast %40 : vector<2x8x1xf32> to vector<2x8x8xf32>
    %42 = arith.mulf %37, %41 : vector<2x8x8xf32>
    "tpu.trace_start"() <{level = 10 : i32, message = "bqk,bkd->bqd"}> : () -> ()
    %cst_22 = arith.constant dense<0.000000e+00> : vector<2x8x8xf32>
    %43 = tpu.matmul %42, %31, %cst_22 {dimension_numbers = #tpu.dot_dimension_numbers<[2], [1], [1], [2], [0, 0, 0, 1, 1, 2], [0], [0]>} : vector<2x8x8xf32>, vector<2x8x8xf32>, vector<2x8x8xf32> -> vector<2x8x8xf32>
    "tpu.trace_stop"() : () -> ()
    %44 = vector.shape_cast %43 : vector<2x8x8xf32> to vector<16x8xf32>
    %45 = vector.extract_strided_slice %24 {offsets = [0, 0], sizes = [8, 32], strides = [1, 1]} : vector<32x32xf32> to vector<8x32xf32>
    %cst_23 = arith.constant dense<0.000000e+00> : vector<16x32xf32>
    %46 = tpu.matmul %44, %45, %cst_23 {dimension_numbers = #tpu.dot_dimension_numbers<[1], [0], [0], [1], [0, 0, 1, 1], [], []>} : vector<16x8xf32>, vector<8x32xf32>, vector<16x32xf32> -> vector<16x32xf32>
    %47 = arith.addf %25, %46 : vector<16x32xf32>
    %48 = vector.extract_strided_slice %20 {offsets = [0, 8], sizes = [16, 8], strides = [1, 1]} : vector<16x32xf32> to vector<16x8xf32>
    %49 = vector.shape_cast %48 : vector<16x8xf32> to vector<2x8x8xf32>
    %50 = vector.extract_strided_slice %21 {offsets = [0, 8], sizes = [16, 8], strides = [1, 1]} : vector<16x32xf32> to vector<16x8xf32>
    %51 = vector.shape_cast %50 : vector<16x8xf32> to vector<2x8x8xf32>
    %52 = vector.extract_strided_slice %22 {offsets = [0, 8], sizes = [16, 8], strides = [1, 1]} : vector<16x32xf32> to vector<16x8xf32>
    %53 = vector.shape_cast %52 : vector<16x8xf32> to vector<2x8x8xf32>
    "tpu.trace_start"() <{level = 10 : i32, message = "bqd,bkd->bqk"}> : () -> ()
    %cst_24 = arith.constant dense<0.000000e+00> : vector<2x8x8xf32>
    %54 = tpu.matmul %49, %51, %cst_24 {dimension_numbers = #tpu.dot_dimension_numbers<[2], [2], [1], [1], [0, 0, 0, 1, 1, 1], [0], [0]>} : vector<2x8x8xf32>, vector<2x8x8xf32>, vector<2x8x8xf32> -> vector<2x8x8xf32>
    "tpu.trace_stop"() : () -> ()
    %cst_25 = arith.constant dense<0xFF800000> : vector<2x8xf32>
    %55 = vector.multi_reduction <maximumf>, %54, %cst_25 [2] : vector<2x8x8xf32> to vector<2x8xf32>
    %56 = vector.shape_cast %55 : vector<2x8xf32> to vector<2x8x1xf32>
    %57 = vector.broadcast %56 : vector<2x8x1xf32> to vector<2x8x8xf32>
    %58 = arith.subf %54, %57 : vector<2x8x8xf32>
    %59 = math.exp %58 : vector<2x8x8xf32>
    %cst_26 = arith.constant dense<0.000000e+00> : vector<2x8xf32>
    %60 = vector.multi_reduction <add>, %59, %cst_26 [2] : vector<2x8x8xf32> to vector<2x8xf32>
    %61 = vector.shape_cast %60 : vector<2x8xf32> to vector<2x8x1xf32>
    %62 = tpu.reciprocal %61 {approx = true} : vector<2x8x1xf32> -> vector<2x8x1xf32>
    %63 = vector.broadcast %62 : vector<2x8x1xf32> to vector<2x8x8xf32>
    %64 = arith.mulf %59, %63 : vector<2x8x8xf32>
    "tpu.trace_start"() <{level = 10 : i32, message = "bqk,bkd->bqd"}> : () -> ()
    %cst_27 = arith.constant dense<0.000000e+00> : vector<2x8x8xf32>
    %65 = tpu.matmul %64, %53, %cst_27 {dimension_numbers = #tpu.dot_dimension_numbers<[2], [1], [1], [2], [0, 0, 0, 1, 1, 2], [0], [0]>} : vector<2x8x8xf32>, vector<2x8x8xf32>, vector<2x8x8xf32> -> vector<2x8x8xf32>
    "tpu.trace_stop"() : () -> ()
    %66 = vector.shape_cast %65 : vector<2x8x8xf32> to vector<16x8xf32>
    %67 = vector.extract_strided_slice %24 {offsets = [8, 0], sizes = [8, 32], strides = [1, 1]} : vector<32x32xf32> to vector<8x32xf32>
    %cst_28 = arith.constant dense<0.000000e+00> : vector<16x32xf32>
    %68 = tpu.matmul %66, %67, %cst_28 {dimension_numbers = #tpu.dot_dimension_numbers<[1], [0], [0], [1], [0, 0, 1, 1], [], []>} : vector<16x8xf32>, vector<8x32xf32>, vector<16x32xf32> -> vector<16x32xf32>
    %69 = arith.addf %47, %68 : vector<16x32xf32>
    %70 = vector.extract_strided_slice %20 {offsets = [0, 16], sizes = [16, 8], strides = [1, 1]} : vector<16x32xf32> to vector<16x8xf32>
    %71 = vector.shape_cast %70 : vector<16x8xf32> to vector<2x8x8xf32>
    %72 = vector.extract_strided_slice %21 {offsets = [0, 16], sizes = [16, 8], strides = [1, 1]} : vector<16x32xf32> to vector<16x8xf32>
    %73 = vector.shape_cast %72 : vector<16x8xf32> to vector<2x8x8xf32>
    %74 = vector.extract_strided_slice %22 {offsets = [0, 16], sizes = [16, 8], strides = [1, 1]} : vector<16x32xf32> to vector<16x8xf32>
    %75 = vector.shape_cast %74 : vector<16x8xf32> to vector<2x8x8xf32>
    "tpu.trace_start"() <{level = 10 : i32, message = "bqd,bkd->bqk"}> : () -> ()
    %cst_29 = arith.constant dense<0.000000e+00> : vector<2x8x8xf32>
    %76 = tpu.matmul %71, %73, %cst_29 {dimension_numbers = #tpu.dot_dimension_numbers<[2], [2], [1], [1], [0, 0, 0, 1, 1, 1], [0], [0]>} : vector<2x8x8xf32>, vector<2x8x8xf32>, vector<2x8x8xf32> -> vector<2x8x8xf32>
    "tpu.trace_stop"() : () -> ()
    %cst_30 = arith.constant dense<0xFF800000> : vector<2x8xf32>
    %77 = vector.multi_reduction <maximumf>, %76, %cst_30 [2] : vector<2x8x8xf32> to vector<2x8xf32>
    %78 = vector.shape_cast %77 : vector<2x8xf32> to vector<2x8x1xf32>
    %79 = vector.broadcast %78 : vector<2x8x1xf32> to vector<2x8x8xf32>
    %80 = arith.subf %76, %79 : vector<2x8x8xf32>
    %81 = math.exp %80 : vector<2x8x8xf32>
    %cst_31 = arith.constant dense<0.000000e+00> : vector<2x8xf32>
    %82 = vector.multi_reduction <add>, %81, %cst_31 [2] : vector<2x8x8xf32> to vector<2x8xf32>
    %83 = vector.shape_cast %82 : vector<2x8xf32> to vector<2x8x1xf32>
    %84 = tpu.reciprocal %83 {approx = true} : vector<2x8x1xf32> -> vector<2x8x1xf32>
    %85 = vector.broadcast %84 : vector<2x8x1xf32> to vector<2x8x8xf32>
    %86 = arith.mulf %81, %85 : vector<2x8x8xf32>
    "tpu.trace_start"() <{level = 10 : i32, message = "bqk,bkd->bqd"}> : () -> ()
    %cst_32 = arith.constant dense<0.000000e+00> : vector<2x8x8xf32>
    %87 = tpu.matmul %86, %75, %cst_32 {dimension_numbers = #tpu.dot_dimension_numbers<[2], [1], [1], [2], [0, 0, 0, 1, 1, 2], [0], [0]>} : vector<2x8x8xf32>, vector<2x8x8xf32>, vector<2x8x8xf32> -> vector<2x8x8xf32>
    "tpu.trace_stop"() : () -> ()
    %88 = vector.shape_cast %87 : vector<2x8x8xf32> to vector<16x8xf32>
    %89 = vector.extract_strided_slice %24 {offsets = [16, 0], sizes = [8, 32], strides = [1, 1]} : vector<32x32xf32> to vector<8x32xf32>
    %cst_33 = arith.constant dense<0.000000e+00> : vector<16x32xf32>
    %90 = tpu.matmul %88, %89, %cst_33 {dimension_numbers = #tpu.dot_dimension_numbers<[1], [0], [0], [1], [0, 0, 1, 1], [], []>} : vector<16x8xf32>, vector<8x32xf32>, vector<16x32xf32> -> vector<16x32xf32>
    %91 = arith.addf %69, %90 : vector<16x32xf32>
    %92 = vector.extract_strided_slice %20 {offsets = [0, 24], sizes = [16, 8], strides = [1, 1]} : vector<16x32xf32> to vector<16x8xf32>
    %93 = vector.shape_cast %92 : vector<16x8xf32> to vector<2x8x8xf32>
    %94 = vector.extract_strided_slice %21 {offsets = [0, 24], sizes = [16, 8], strides = [1, 1]} : vector<16x32xf32> to vector<16x8xf32>
    %95 = vector.shape_cast %94 : vector<16x8xf32> to vector<2x8x8xf32>
    %96 = vector.extract_strided_slice %22 {offsets = [0, 24], sizes = [16, 8], strides = [1, 1]} : vector<16x32xf32> to vector<16x8xf32>
    %97 = vector.shape_cast %96 : vector<16x8xf32> to vector<2x8x8xf32>
    "tpu.trace_start"() <{level = 10 : i32, message = "bqd,bkd->bqk"}> : () -> ()
    %cst_34 = arith.constant dense<0.000000e+00> : vector<2x8x8xf32>
    %98 = tpu.matmul %93, %95, %cst_34 {dimension_numbers = #tpu.dot_dimension_numbers<[2], [2], [1], [1], [0, 0, 0, 1, 1, 1], [0], [0]>} : vector<2x8x8xf32>, vector<2x8x8xf32>, vector<2x8x8xf32> -> vector<2x8x8xf32>
    "tpu.trace_stop"() : () -> ()
    %cst_35 = arith.constant dense<0xFF800000> : vector<2x8xf32>
    %99 = vector.multi_reduction <maximumf>, %98, %cst_35 [2] : vector<2x8x8xf32> to vector<2x8xf32>
    %100 = vector.shape_cast %99 : vector<2x8xf32> to vector<2x8x1xf32>
    %101 = vector.broadcast %100 : vector<2x8x1xf32> to vector<2x8x8xf32>
    %102 = arith.subf %98, %101 : vector<2x8x8xf32>
    %103 = math.exp %102 : vector<2x8x8xf32>
    %cst_36 = arith.constant dense<0.000000e+00> : vector<2x8xf32>
    %104 = vector.multi_reduction <add>, %103, %cst_36 [2] : vector<2x8x8xf32> to vector<2x8xf32>
    %105 = vector.shape_cast %104 : vector<2x8xf32> to vector<2x8x1xf32>
    %106 = tpu.reciprocal %105 {approx = true} : vector<2x8x1xf32> -> vector<2x8x1xf32>
    %107 = vector.broadcast %106 : vector<2x8x1xf32> to vector<2x8x8xf32>
    %108 = arith.mulf %103, %107 : vector<2x8x8xf32>
    "tpu.trace_start"() <{level = 10 : i32, message = "bqk,bkd->bqd"}> : () -> ()
    %cst_37 = arith.constant dense<0.000000e+00> : vector<2x8x8xf32>
    %109 = tpu.matmul %108, %97, %cst_37 {dimension_numbers = #tpu.dot_dimension_numbers<[2], [1], [1], [2], [0, 0, 0, 1, 1, 2], [0], [0]>} : vector<2x8x8xf32>, vector<2x8x8xf32>, vector<2x8x8xf32> -> vector<2x8x8xf32>
    "tpu.trace_stop"() : () -> ()
    %110 = vector.shape_cast %109 : vector<2x8x8xf32> to vector<16x8xf32>
    %111 = vector.extract_strided_slice %24 {offsets = [24, 0], sizes = [8, 32], strides = [1, 1]} : vector<32x32xf32> to vector<8x32xf32>
    %cst_38 = arith.constant dense<0.000000e+00> : vector<16x32xf32>
    %112 = tpu.matmul %110, %111, %cst_38 {dimension_numbers = #tpu.dot_dimension_numbers<[1], [0], [0], [1], [0, 0, 1, 1], [], []>} : vector<16x8xf32>, vector<8x32xf32>, vector<16x32xf32> -> vector<16x32xf32>
    %113 = arith.addf %91, %112 : vector<16x32xf32>
    %c0_39 = arith.constant 0 : index
    %c0_40 = arith.constant 0 : index
    %c0_41 = arith.constant 0 : index
    %114 = vector.load %arg7[%c0_39, %c0_40, %c0_41] : memref<2x1x32xf32, #tpu.memory_space<vmem>>, vector<1x1x32xf32>
    %115 = vector.shape_cast %114 : vector<1x1x32xf32> to vector<1x32xf32>
    %116 = vector.broadcast %115 : vector<1x32xf32> to vector<16x32xf32>
    %117 = arith.addf %113, %116 : vector<16x32xf32>
    %118 = arith.addf %12, %117 : vector<16x32xf32>
    %c0_42 = arith.constant 0 : index
    %c0_43 = arith.constant 0 : index
    %c0_44 = arith.constant 0 : index
    %119 = vector.load %arg8[%c0_42, %c0_43, %c0_44] : memref<2x1x32xf32, #tpu.memory_space<vmem>>, vector<1x1x32xf32>
    %120 = vector.shape_cast %119 : vector<1x1x32xf32> to vector<1x32xf32>
    %c0_45 = arith.constant 0 : index
    %c0_46 = arith.constant 0 : index
    %c0_47 = arith.constant 0 : index
    %121 = vector.load %arg9[%c0_45, %c0_46, %c0_47] : memref<2x1x32xf32, #tpu.memory_space<vmem>>, vector<1x1x32xf32>
    %122 = vector.shape_cast %121 : vector<1x1x32xf32> to vector<1x32xf32>
    %cst_48 = arith.constant dense<0.000000e+00> : vector<16xf32>
    %123 = vector.multi_reduction <add>, %118, %cst_48 [1] : vector<16x32xf32> to vector<16xf32>
    %124 = vector.shape_cast %123 : vector<16xf32> to vector<16x1xf32>
    %cst_49 = arith.constant 3.200000e+01 : f32
    %125 = vector.broadcast %cst_49 : f32 to vector<16x1xf32>
    %126 = arith.divf %124, %125 : vector<16x1xf32>
    %127 = vector.broadcast %126 : vector<16x1xf32> to vector<16x32xf32>
    %128 = arith.subf %118, %127 : vector<16x32xf32>
    %129 = arith.mulf %128, %128 : vector<16x32xf32>
    %cst_50 = arith.constant dense<0.000000e+00> : vector<16xf32>
    %130 = vector.multi_reduction <add>, %129, %cst_50 [1] : vector<16x32xf32> to vector<16xf32>
    %131 = vector.shape_cast %130 : vector<16xf32> to vector<16x1xf32>
    %cst_51 = arith.constant 3.200000e+01 : f32
    %132 = vector.broadcast %cst_51 : f32 to vector<16x1xf32>
    %133 = arith.divf %131, %132 : vector<16x1xf32>
    %134 = vector.broadcast %126 : vector<16x1xf32> to vector<16x32xf32>
    %135 = arith.subf %118, %134 : vector<16x32xf32>
    %cst_52 = arith.constant 9.99999974E-6 : f32
    %136 = vector.broadcast %cst_52 : f32 to vector<16x1xf32>
    %137 = arith.addf %133, %136 : vector<16x1xf32>
    %138 = math.rsqrt %137 : vector<16x1xf32>
    %139 = vector.broadcast %138 : vector<16x1xf32> to vector<16x32xf32>
    %140 = arith.mulf %135, %139 : vector<16x32xf32>
    %141 = vector.broadcast %120 : vector<1x32xf32> to vector<16x32xf32>
    %142 = arith.mulf %140, %141 : vector<16x32xf32>
    %143 = vector.broadcast %122 : vector<1x32xf32> to vector<16x32xf32>
    %144 = arith.addf %142, %143 : vector<16x32xf32>
    %c0_53 = arith.constant 0 : index
    %c0_54 = arith.constant 0 : index
    %c0_55 = arith.constant 0 : index
    %145 = vector.load %arg10[%c0_53, %c0_54, %c0_55] : memref<2x32x64xf32, #tpu.memory_space<vmem>>, vector<1x32x64xf32>
    %146 = vector.shape_cast %145 : vector<1x32x64xf32> to vector<32x64xf32>
    %cst_56 = arith.constant dense<0.000000e+00> : vector<16x64xf32>
    %147 = tpu.matmul %144, %146, %cst_56 {dimension_numbers = #tpu.dot_dimension_numbers<[1], [0], [0], [1], [0, 0, 1, 1], [], []>} : vector<16x32xf32>, vector<32x64xf32>, vector<16x64xf32> -> vector<16x64xf32>
    %c0_57 = arith.constant 0 : index
    %c0_58 = arith.constant 0 : index
    %c0_59 = arith.constant 0 : index
    %148 = vector.load %arg11[%c0_57, %c0_58, %c0_59] : memref<2x1x64xf32, #tpu.memory_space<vmem>>, vector<1x1x64xf32>
    %149 = vector.shape_cast %148 : vector<1x1x64xf32> to vector<1x64xf32>
    %150 = vector.broadcast %149 : vector<1x64xf32> to vector<16x64xf32>
    %151 = arith.addf %147, %150 : vector<16x64xf32>
    %cst_60 = arith.constant 0.000000e+00 : f32
    %152 = vector.broadcast %cst_60 : f32 to vector<16x64xf32>
    %153 = arith.maximumf %151, %152 : vector<16x64xf32>
    %c0_61 = arith.constant 0 : index
    %c0_62 = arith.constant 0 : index
    %c0_63 = arith.constant 0 : index
    %154 = vector.load %arg12[%c0_61, %c0_62, %c0_63] : memref<2x64x32xf32, #tpu.memory_space<vmem>>, vector<1x64x32xf32>
    %155 = vector.shape_cast %154 : vector<1x64x32xf32> to vector<64x32xf32>
    %cst_64 = arith.constant dense<0.000000e+00> : vector<16x32xf32>
    %156 = tpu.matmul %153, %155, %cst_64 {dimension_numbers = #tpu.dot_dimension_numbers<[1], [0], [0], [1], [0, 0, 1, 1], [], []>} : vector<16x64xf32>, vector<64x32xf32>, vector<16x32xf32> -> vector<16x32xf32>
    %c0_65 = arith.constant 0 : index
    %c0_66 = arith.constant 0 : index
    %c0_67 = arith.constant 0 : index
    %157 = vector.load %arg13[%c0_65, %c0_66, %c0_67] : memref<2x1x32xf32, #tpu.memory_space<vmem>>, vector<1x1x32xf32>
    %158 = vector.shape_cast %157 : vector<1x1x32xf32> to vector<1x32xf32>
    %159 = vector.broadcast %158 : vector<1x32xf32> to vector<16x32xf32>
    %160 = arith.addf %156, %159 : vector<16x32xf32>
    %161 = arith.addf %144, %160 : vector<16x32xf32>
    %c0_68 = arith.constant 0 : index
    %c0_69 = arith.constant 0 : index
    %c0_70 = arith.constant 0 : index
    %162 = vector.load %arg14[%c0_68, %c0_69, %c0_70] : memref<2x1x32xf32, #tpu.memory_space<vmem>>, vector<1x1x32xf32>
    %163 = vector.shape_cast %162 : vector<1x1x32xf32> to vector<1x32xf32>
    %c0_71 = arith.constant 0 : index
    %c0_72 = arith.constant 0 : index
    %c0_73 = arith.constant 0 : index
    %164 = vector.load %arg15[%c0_71, %c0_72, %c0_73] : memref<2x1x32xf32, #tpu.memory_space<vmem>>, vector<1x1x32xf32>
    %165 = vector.shape_cast %164 : vector<1x1x32xf32> to vector<1x32xf32>
    %cst_74 = arith.constant dense<0.000000e+00> : vector<16xf32>
    %166 = vector.multi_reduction <add>, %161, %cst_74 [1] : vector<16x32xf32> to vector<16xf32>
    %167 = vector.shape_cast %166 : vector<16xf32> to vector<16x1xf32>
    %cst_75 = arith.constant 3.200000e+01 : f32
    %168 = vector.broadcast %cst_75 : f32 to vector<16x1xf32>
    %169 = arith.divf %167, %168 : vector<16x1xf32>
    %170 = vector.broadcast %169 : vector<16x1xf32> to vector<16x32xf32>
    %171 = arith.subf %161, %170 : vector<16x32xf32>
    %172 = arith.mulf %171, %171 : vector<16x32xf32>
    %cst_76 = arith.constant dense<0.000000e+00> : vector<16xf32>
    %173 = vector.multi_reduction <add>, %172, %cst_76 [1] : vector<16x32xf32> to vector<16xf32>
    %174 = vector.shape_cast %173 : vector<16xf32> to vector<16x1xf32>
    %cst_77 = arith.constant 3.200000e+01 : f32
    %175 = vector.broadcast %cst_77 : f32 to vector<16x1xf32>
    %176 = arith.divf %174, %175 : vector<16x1xf32>
    %177 = vector.broadcast %169 : vector<16x1xf32> to vector<16x32xf32>
    %178 = arith.subf %161, %177 : vector<16x32xf32>
    %cst_78 = arith.constant 9.99999974E-6 : f32
    %179 = vector.broadcast %cst_78 : f32 to vector<16x1xf32>
    %180 = arith.addf %176, %179 : vector<16x1xf32>
    %181 = math.rsqrt %180 : vector<16x1xf32>
    %182 = vector.broadcast %181 : vector<16x1xf32> to vector<16x32xf32>
    %183 = arith.mulf %178, %182 : vector<16x32xf32>
    %184 = vector.broadcast %163 : vector<1x32xf32> to vector<16x32xf32>
    %185 = arith.mulf %183, %184 : vector<16x32xf32>
    %186 = vector.broadcast %165 : vector<1x32xf32> to vector<16x32xf32>
    %187 = arith.addf %185, %186 : vector<16x32xf32>
    %c1 = arith.constant 1 : index
    %c0_79 = arith.constant 0 : index
    %c0_80 = arith.constant 0 : index
    %188 = vector.load %arg4[%c1, %c0_79, %c0_80] : memref<2x32x96xf32, #tpu.memory_space<vmem>>, vector<1x32x96xf32>
    %189 = vector.shape_cast %188 : vector<1x32x96xf32> to vector<32x96xf32>
    %cst_81 = arith.constant dense<0.000000e+00> : vector<16x96xf32>
    %190 = tpu.matmul %187, %189, %cst_81 {dimension_numbers = #tpu.dot_dimension_numbers<[1], [0], [0], [1], [0, 0, 1, 1], [], []>} : vector<16x32xf32>, vector<32x96xf32>, vector<16x96xf32> -> vector<16x96xf32>
    %c1_82 = arith.constant 1 : index
    %c0_83 = arith.constant 0 : index
    %c0_84 = arith.constant 0 : index
    %191 = vector.load %arg5[%c1_82, %c0_83, %c0_84] : memref<2x1x96xf32, #tpu.memory_space<vmem>>, vector<1x1x96xf32>
    %192 = vector.shape_cast %191 : vector<1x1x96xf32> to vector<1x96xf32>
    %193 = vector.broadcast %192 : vector<1x96xf32> to vector<16x96xf32>
    %194 = arith.addf %190, %193 : vector<16x96xf32>
    %195 = vector.extract_strided_slice %194 {offsets = [0, 0], sizes = [16, 32], strides = [1, 1]} : vector<16x96xf32> to vector<16x32xf32>
    %196 = vector.extract_strided_slice %194 {offsets = [0, 32], sizes = [16, 32], strides = [1, 1]} : vector<16x96xf32> to vector<16x32xf32>
    %197 = vector.extract_strided_slice %194 {offsets = [0, 64], sizes = [16, 32], strides = [1, 1]} : vector<16x96xf32> to vector<16x32xf32>
    %c1_85 = arith.constant 1 : index
    %c0_86 = arith.constant 0 : index
    %c0_87 = arith.constant 0 : index
    %198 = vector.load %arg6[%c1_85, %c0_86, %c0_87] : memref<2x32x32xf32, #tpu.memory_space<vmem>>, vector<1x32x32xf32>
    %199 = vector.shape_cast %198 : vector<1x32x32xf32> to vector<32x32xf32>
    %cst_88 = arith.constant 0.000000e+00 : f32
    %200 = vector.broadcast %cst_88 : f32 to vector<16x32xf32>
    %201 = vector.extract_strided_slice %195 {offsets = [0, 0], sizes = [16, 8], strides = [1, 1]} : vector<16x32xf32> to vector<16x8xf32>
    %202 = vector.shape_cast %201 : vector<16x8xf32> to vector<2x8x8xf32>
    %203 = vector.extract_strided_slice %196 {offsets = [0, 0], sizes = [16, 8], strides = [1, 1]} : vector<16x32xf32> to vector<16x8xf32>
    %204 = vector.shape_cast %203 : vector<16x8xf32> to vector<2x8x8xf32>
    %205 = vector.extract_strided_slice %197 {offsets = [0, 0], sizes = [16, 8], strides = [1, 1]} : vector<16x32xf32> to vector<16x8xf32>
    %206 = vector.shape_cast %205 : vector<16x8xf32> to vector<2x8x8xf32>
    "tpu.trace_start"() <{level = 10 : i32, message = "bqd,bkd->bqk"}> : () -> ()
    %cst_89 = arith.constant dense<0.000000e+00> : vector<2x8x8xf32>
    %207 = tpu.matmul %202, %204, %cst_89 {dimension_numbers = #tpu.dot_dimension_numbers<[2], [2], [1], [1], [0, 0, 0, 1, 1, 1], [0], [0]>} : vector<2x8x8xf32>, vector<2x8x8xf32>, vector<2x8x8xf32> -> vector<2x8x8xf32>
    "tpu.trace_stop"() : () -> ()
    %cst_90 = arith.constant dense<0xFF800000> : vector<2x8xf32>
    %208 = vector.multi_reduction <maximumf>, %207, %cst_90 [2] : vector<2x8x8xf32> to vector<2x8xf32>
    %209 = vector.shape_cast %208 : vector<2x8xf32> to vector<2x8x1xf32>
    %210 = vector.broadcast %209 : vector<2x8x1xf32> to vector<2x8x8xf32>
    %211 = arith.subf %207, %210 : vector<2x8x8xf32>
    %212 = math.exp %211 : vector<2x8x8xf32>
    %cst_91 = arith.constant dense<0.000000e+00> : vector<2x8xf32>
    %213 = vector.multi_reduction <add>, %212, %cst_91 [2] : vector<2x8x8xf32> to vector<2x8xf32>
    %214 = vector.shape_cast %213 : vector<2x8xf32> to vector<2x8x1xf32>
    %215 = tpu.reciprocal %214 {approx = true} : vector<2x8x1xf32> -> vector<2x8x1xf32>
    %216 = vector.broadcast %215 : vector<2x8x1xf32> to vector<2x8x8xf32>
    %217 = arith.mulf %212, %216 : vector<2x8x8xf32>
    "tpu.trace_start"() <{level = 10 : i32, message = "bqk,bkd->bqd"}> : () -> ()
    %cst_92 = arith.constant dense<0.000000e+00> : vector<2x8x8xf32>
    %218 = tpu.matmul %217, %206, %cst_92 {dimension_numbers = #tpu.dot_dimension_numbers<[2], [1], [1], [2], [0, 0, 0, 1, 1, 2], [0], [0]>} : vector<2x8x8xf32>, vector<2x8x8xf32>, vector<2x8x8xf32> -> vector<2x8x8xf32>
    "tpu.trace_stop"() : () -> ()
    %219 = vector.shape_cast %218 : vector<2x8x8xf32> to vector<16x8xf32>
    %220 = vector.extract_strided_slice %199 {offsets = [0, 0], sizes = [8, 32], strides = [1, 1]} : vector<32x32xf32> to vector<8x32xf32>
    %cst_93 = arith.constant dense<0.000000e+00> : vector<16x32xf32>
    %221 = tpu.matmul %219, %220, %cst_93 {dimension_numbers = #tpu.dot_dimension_numbers<[1], [0], [0], [1], [0, 0, 1, 1], [], []>} : vector<16x8xf32>, vector<8x32xf32>, vector<16x32xf32> -> vector<16x32xf32>
    %222 = arith.addf %200, %221 : vector<16x32xf32>
    %223 = vector.extract_strided_slice %195 {offsets = [0, 8], sizes = [16, 8], strides = [1, 1]} : vector<16x32xf32> to vector<16x8xf32>
    %224 = vector.shape_cast %223 : vector<16x8xf32> to vector<2x8x8xf32>
    %225 = vector.extract_strided_slice %196 {offsets = [0, 8], sizes = [16, 8], strides = [1, 1]} : vector<16x32xf32> to vector<16x8xf32>
    %226 = vector.shape_cast %225 : vector<16x8xf32> to vector<2x8x8xf32>
    %227 = vector.extract_strided_slice %197 {offsets = [0, 8], sizes = [16, 8], strides = [1, 1]} : vector<16x32xf32> to vector<16x8xf32>
    %228 = vector.shape_cast %227 : vector<16x8xf32> to vector<2x8x8xf32>
    "tpu.trace_start"() <{level = 10 : i32, message = "bqd,bkd->bqk"}> : () -> ()
    %cst_94 = arith.constant dense<0.000000e+00> : vector<2x8x8xf32>
    %229 = tpu.matmul %224, %226, %cst_94 {dimension_numbers = #tpu.dot_dimension_numbers<[2], [2], [1], [1], [0, 0, 0, 1, 1, 1], [0], [0]>} : vector<2x8x8xf32>, vector<2x8x8xf32>, vector<2x8x8xf32> -> vector<2x8x8xf32>
    "tpu.trace_stop"() : () -> ()
    %cst_95 = arith.constant dense<0xFF800000> : vector<2x8xf32>
    %230 = vector.multi_reduction <maximumf>, %229, %cst_95 [2] : vector<2x8x8xf32> to vector<2x8xf32>
    %231 = vector.shape_cast %230 : vector<2x8xf32> to vector<2x8x1xf32>
    %232 = vector.broadcast %231 : vector<2x8x1xf32> to vector<2x8x8xf32>
    %233 = arith.subf %229, %232 : vector<2x8x8xf32>
    %234 = math.exp %233 : vector<2x8x8xf32>
    %cst_96 = arith.constant dense<0.000000e+00> : vector<2x8xf32>
    %235 = vector.multi_reduction <add>, %234, %cst_96 [2] : vector<2x8x8xf32> to vector<2x8xf32>
    %236 = vector.shape_cast %235 : vector<2x8xf32> to vector<2x8x1xf32>
    %237 = tpu.reciprocal %236 {approx = true} : vector<2x8x1xf32> -> vector<2x8x1xf32>
    %238 = vector.broadcast %237 : vector<2x8x1xf32> to vector<2x8x8xf32>
    %239 = arith.mulf %234, %238 : vector<2x8x8xf32>
    "tpu.trace_start"() <{level = 10 : i32, message = "bqk,bkd->bqd"}> : () -> ()
    %cst_97 = arith.constant dense<0.000000e+00> : vector<2x8x8xf32>
    %240 = tpu.matmul %239, %228, %cst_97 {dimension_numbers = #tpu.dot_dimension_numbers<[2], [1], [1], [2], [0, 0, 0, 1, 1, 2], [0], [0]>} : vector<2x8x8xf32>, vector<2x8x8xf32>, vector<2x8x8xf32> -> vector<2x8x8xf32>
    "tpu.trace_stop"() : () -> ()
    %241 = vector.shape_cast %240 : vector<2x8x8xf32> to vector<16x8xf32>
    %242 = vector.extract_strided_slice %199 {offsets = [8, 0], sizes = [8, 32], strides = [1, 1]} : vector<32x32xf32> to vector<8x32xf32>
    %cst_98 = arith.constant dense<0.000000e+00> : vector<16x32xf32>
    %243 = tpu.matmul %241, %242, %cst_98 {dimension_numbers = #tpu.dot_dimension_numbers<[1], [0], [0], [1], [0, 0, 1, 1], [], []>} : vector<16x8xf32>, vector<8x32xf32>, vector<16x32xf32> -> vector<16x32xf32>
    %244 = arith.addf %222, %243 : vector<16x32xf32>
    %245 = vector.extract_strided_slice %195 {offsets = [0, 16], sizes = [16, 8], strides = [1, 1]} : vector<16x32xf32> to vector<16x8xf32>
    %246 = vector.shape_cast %245 : vector<16x8xf32> to vector<2x8x8xf32>
    %247 = vector.extract_strided_slice %196 {offsets = [0, 16], sizes = [16, 8], strides = [1, 1]} : vector<16x32xf32> to vector<16x8xf32>
    %248 = vector.shape_cast %247 : vector<16x8xf32> to vector<2x8x8xf32>
    %249 = vector.extract_strided_slice %197 {offsets = [0, 16], sizes = [16, 8], strides = [1, 1]} : vector<16x32xf32> to vector<16x8xf32>
    %250 = vector.shape_cast %249 : vector<16x8xf32> to vector<2x8x8xf32>
    "tpu.trace_start"() <{level = 10 : i32, message = "bqd,bkd->bqk"}> : () -> ()
    %cst_99 = arith.constant dense<0.000000e+00> : vector<2x8x8xf32>
    %251 = tpu.matmul %246, %248, %cst_99 {dimension_numbers = #tpu.dot_dimension_numbers<[2], [2], [1], [1], [0, 0, 0, 1, 1, 1], [0], [0]>} : vector<2x8x8xf32>, vector<2x8x8xf32>, vector<2x8x8xf32> -> vector<2x8x8xf32>
    "tpu.trace_stop"() : () -> ()
    %cst_100 = arith.constant dense<0xFF800000> : vector<2x8xf32>
    %252 = vector.multi_reduction <maximumf>, %251, %cst_100 [2] : vector<2x8x8xf32> to vector<2x8xf32>
    %253 = vector.shape_cast %252 : vector<2x8xf32> to vector<2x8x1xf32>
    %254 = vector.broadcast %253 : vector<2x8x1xf32> to vector<2x8x8xf32>
    %255 = arith.subf %251, %254 : vector<2x8x8xf32>
    %256 = math.exp %255 : vector<2x8x8xf32>
    %cst_101 = arith.constant dense<0.000000e+00> : vector<2x8xf32>
    %257 = vector.multi_reduction <add>, %256, %cst_101 [2] : vector<2x8x8xf32> to vector<2x8xf32>
    %258 = vector.shape_cast %257 : vector<2x8xf32> to vector<2x8x1xf32>
    %259 = tpu.reciprocal %258 {approx = true} : vector<2x8x1xf32> -> vector<2x8x1xf32>
    %260 = vector.broadcast %259 : vector<2x8x1xf32> to vector<2x8x8xf32>
    %261 = arith.mulf %256, %260 : vector<2x8x8xf32>
    "tpu.trace_start"() <{level = 10 : i32, message = "bqk,bkd->bqd"}> : () -> ()
    %cst_102 = arith.constant dense<0.000000e+00> : vector<2x8x8xf32>
    %262 = tpu.matmul %261, %250, %cst_102 {dimension_numbers = #tpu.dot_dimension_numbers<[2], [1], [1], [2], [0, 0, 0, 1, 1, 2], [0], [0]>} : vector<2x8x8xf32>, vector<2x8x8xf32>, vector<2x8x8xf32> -> vector<2x8x8xf32>
    "tpu.trace_stop"() : () -> ()
    %263 = vector.shape_cast %262 : vector<2x8x8xf32> to vector<16x8xf32>
    %264 = vector.extract_strided_slice %199 {offsets = [16, 0], sizes = [8, 32], strides = [1, 1]} : vector<32x32xf32> to vector<8x32xf32>
    %cst_103 = arith.constant dense<0.000000e+00> : vector<16x32xf32>
    %265 = tpu.matmul %263, %264, %cst_103 {dimension_numbers = #tpu.dot_dimension_numbers<[1], [0], [0], [1], [0, 0, 1, 1], [], []>} : vector<16x8xf32>, vector<8x32xf32>, vector<16x32xf32> -> vector<16x32xf32>
    %266 = arith.addf %244, %265 : vector<16x32xf32>
    %267 = vector.extract_strided_slice %195 {offsets = [0, 24], sizes = [16, 8], strides = [1, 1]} : vector<16x32xf32> to vector<16x8xf32>
    %268 = vector.shape_cast %267 : vector<16x8xf32> to vector<2x8x8xf32>
    %269 = vector.extract_strided_slice %196 {offsets = [0, 24], sizes = [16, 8], strides = [1, 1]} : vector<16x32xf32> to vector<16x8xf32>
    %270 = vector.shape_cast %269 : vector<16x8xf32> to vector<2x8x8xf32>
    %271 = vector.extract_strided_slice %197 {offsets = [0, 24], sizes = [16, 8], strides = [1, 1]} : vector<16x32xf32> to vector<16x8xf32>
    %272 = vector.shape_cast %271 : vector<16x8xf32> to vector<2x8x8xf32>
    "tpu.trace_start"() <{level = 10 : i32, message = "bqd,bkd->bqk"}> : () -> ()
    %cst_104 = arith.constant dense<0.000000e+00> : vector<2x8x8xf32>
    %273 = tpu.matmul %268, %270, %cst_104 {dimension_numbers = #tpu.dot_dimension_numbers<[2], [2], [1], [1], [0, 0, 0, 1, 1, 1], [0], [0]>} : vector<2x8x8xf32>, vector<2x8x8xf32>, vector<2x8x8xf32> -> vector<2x8x8xf32>
    "tpu.trace_stop"() : () -> ()
    %cst_105 = arith.constant dense<0xFF800000> : vector<2x8xf32>
    %274 = vector.multi_reduction <maximumf>, %273, %cst_105 [2] : vector<2x8x8xf32> to vector<2x8xf32>
    %275 = vector.shape_cast %274 : vector<2x8xf32> to vector<2x8x1xf32>
    %276 = vector.broadcast %275 : vector<2x8x1xf32> to vector<2x8x8xf32>
    %277 = arith.subf %273, %276 : vector<2x8x8xf32>
    %278 = math.exp %277 : vector<2x8x8xf32>
    %cst_106 = arith.constant dense<0.000000e+00> : vector<2x8xf32>
    %279 = vector.multi_reduction <add>, %278, %cst_106 [2] : vector<2x8x8xf32> to vector<2x8xf32>
    %280 = vector.shape_cast %279 : vector<2x8xf32> to vector<2x8x1xf32>
    %281 = tpu.reciprocal %280 {approx = true} : vector<2x8x1xf32> -> vector<2x8x1xf32>
    %282 = vector.broadcast %281 : vector<2x8x1xf32> to vector<2x8x8xf32>
    %283 = arith.mulf %278, %282 : vector<2x8x8xf32>
    "tpu.trace_start"() <{level = 10 : i32, message = "bqk,bkd->bqd"}> : () -> ()
    %cst_107 = arith.constant dense<0.000000e+00> : vector<2x8x8xf32>
    %284 = tpu.matmul %283, %272, %cst_107 {dimension_numbers = #tpu.dot_dimension_numbers<[2], [1], [1], [2], [0, 0, 0, 1, 1, 2], [0], [0]>} : vector<2x8x8xf32>, vector<2x8x8xf32>, vector<2x8x8xf32> -> vector<2x8x8xf32>
    "tpu.trace_stop"() : () -> ()
    %285 = vector.shape_cast %284 : vector<2x8x8xf32> to vector<16x8xf32>
    %286 = vector.extract_strided_slice %199 {offsets = [24, 0], sizes = [8, 32], strides = [1, 1]} : vector<32x32xf32> to vector<8x32xf32>
    %cst_108 = arith.constant dense<0.000000e+00> : vector<16x32xf32>
    %287 = tpu.matmul %285, %286, %cst_108 {dimension_numbers = #tpu.dot_dimension_numbers<[1], [0], [0], [1], [0, 0, 1, 1], [], []>} : vector<16x8xf32>, vector<8x32xf32>, vector<16x32xf32> -> vector<16x32xf32>
    %288 = arith.addf %266, %287 : vector<16x32xf32>
    %c1_109 = arith.constant 1 : index
    %c0_110 = arith.constant 0 : index
    %c0_111 = arith.constant 0 : index
    %289 = vector.load %arg7[%c1_109, %c0_110, %c0_111] : memref<2x1x32xf32, #tpu.memory_space<vmem>>, vector<1x1x32xf32>
    %290 = vector.shape_cast %289 : vector<1x1x32xf32> to vector<1x32xf32>
    %291 = vector.broadcast %290 : vector<1x32xf32> to vector<16x32xf32>
    %292 = arith.addf %288, %291 : vector<16x32xf32>
    %293 = arith.addf %187, %292 : vector<16x32xf32>
    %c1_112 = arith.constant 1 : index
    %c0_113 = arith.constant 0 : index
    %c0_114 = arith.constant 0 : index
    %294 = vector.load %arg8[%c1_112, %c0_113, %c0_114] : memref<2x1x32xf32, #tpu.memory_space<vmem>>, vector<1x1x32xf32>
    %295 = vector.shape_cast %294 : vector<1x1x32xf32> to vector<1x32xf32>
    %c1_115 = arith.constant 1 : index
    %c0_116 = arith.constant 0 : index
    %c0_117 = arith.constant 0 : index
    %296 = vector.load %arg9[%c1_115, %c0_116, %c0_117] : memref<2x1x32xf32, #tpu.memory_space<vmem>>, vector<1x1x32xf32>
    %297 = vector.shape_cast %296 : vector<1x1x32xf32> to vector<1x32xf32>
    %cst_118 = arith.constant dense<0.000000e+00> : vector<16xf32>
    %298 = vector.multi_reduction <add>, %293, %cst_118 [1] : vector<16x32xf32> to vector<16xf32>
    %299 = vector.shape_cast %298 : vector<16xf32> to vector<16x1xf32>
    %cst_119 = arith.constant 3.200000e+01 : f32
    %300 = vector.broadcast %cst_119 : f32 to vector<16x1xf32>
    %301 = arith.divf %299, %300 : vector<16x1xf32>
    %302 = vector.broadcast %301 : vector<16x1xf32> to vector<16x32xf32>
    %303 = arith.subf %293, %302 : vector<16x32xf32>
    %304 = arith.mulf %303, %303 : vector<16x32xf32>
    %cst_120 = arith.constant dense<0.000000e+00> : vector<16xf32>
    %305 = vector.multi_reduction <add>, %304, %cst_120 [1] : vector<16x32xf32> to vector<16xf32>
    %306 = vector.shape_cast %305 : vector<16xf32> to vector<16x1xf32>
    %cst_121 = arith.constant 3.200000e+01 : f32
    %307 = vector.broadcast %cst_121 : f32 to vector<16x1xf32>
    %308 = arith.divf %306, %307 : vector<16x1xf32>
    %309 = vector.broadcast %301 : vector<16x1xf32> to vector<16x32xf32>
    %310 = arith.subf %293, %309 : vector<16x32xf32>
    %cst_122 = arith.constant 9.99999974E-6 : f32
    %311 = vector.broadcast %cst_122 : f32 to vector<16x1xf32>
    %312 = arith.addf %308, %311 : vector<16x1xf32>
    %313 = math.rsqrt %312 : vector<16x1xf32>
    %314 = vector.broadcast %313 : vector<16x1xf32> to vector<16x32xf32>
    %315 = arith.mulf %310, %314 : vector<16x32xf32>
    %316 = vector.broadcast %295 : vector<1x32xf32> to vector<16x32xf32>
    %317 = arith.mulf %315, %316 : vector<16x32xf32>
    %318 = vector.broadcast %297 : vector<1x32xf32> to vector<16x32xf32>
    %319 = arith.addf %317, %318 : vector<16x32xf32>
    %c1_123 = arith.constant 1 : index
    %c0_124 = arith.constant 0 : index
    %c0_125 = arith.constant 0 : index
    %320 = vector.load %arg10[%c1_123, %c0_124, %c0_125] : memref<2x32x64xf32, #tpu.memory_space<vmem>>, vector<1x32x64xf32>
    %321 = vector.shape_cast %320 : vector<1x32x64xf32> to vector<32x64xf32>
    %cst_126 = arith.constant dense<0.000000e+00> : vector<16x64xf32>
    %322 = tpu.matmul %319, %321, %cst_126 {dimension_numbers = #tpu.dot_dimension_numbers<[1], [0], [0], [1], [0, 0, 1, 1], [], []>} : vector<16x32xf32>, vector<32x64xf32>, vector<16x64xf32> -> vector<16x64xf32>
    %c1_127 = arith.constant 1 : index
    %c0_128 = arith.constant 0 : index
    %c0_129 = arith.constant 0 : index
    %323 = vector.load %arg11[%c1_127, %c0_128, %c0_129] : memref<2x1x64xf32, #tpu.memory_space<vmem>>, vector<1x1x64xf32>
    %324 = vector.shape_cast %323 : vector<1x1x64xf32> to vector<1x64xf32>
    %325 = vector.broadcast %324 : vector<1x64xf32> to vector<16x64xf32>
    %326 = arith.addf %322, %325 : vector<16x64xf32>
    %cst_130 = arith.constant 0.000000e+00 : f32
    %327 = vector.broadcast %cst_130 : f32 to vector<16x64xf32>
    %328 = arith.maximumf %326, %327 : vector<16x64xf32>
    %c1_131 = arith.constant 1 : index
    %c0_132 = arith.constant 0 : index
    %c0_133 = arith.constant 0 : index
    %329 = vector.load %arg12[%c1_131, %c0_132, %c0_133] : memref<2x64x32xf32, #tpu.memory_space<vmem>>, vector<1x64x32xf32>
    %330 = vector.shape_cast %329 : vector<1x64x32xf32> to vector<64x32xf32>
    %cst_134 = arith.constant dense<0.000000e+00> : vector<16x32xf32>
    %331 = tpu.matmul %328, %330, %cst_134 {dimension_numbers = #tpu.dot_dimension_numbers<[1], [0], [0], [1], [0, 0, 1, 1], [], []>} : vector<16x64xf32>, vector<64x32xf32>, vector<16x32xf32> -> vector<16x32xf32>
    %c1_135 = arith.constant 1 : index
    %c0_136 = arith.constant 0 : index
    %c0_137 = arith.constant 0 : index
    %332 = vector.load %arg13[%c1_135, %c0_136, %c0_137] : memref<2x1x32xf32, #tpu.memory_space<vmem>>, vector<1x1x32xf32>
    %333 = vector.shape_cast %332 : vector<1x1x32xf32> to vector<1x32xf32>
    %334 = vector.broadcast %333 : vector<1x32xf32> to vector<16x32xf32>
    %335 = arith.addf %331, %334 : vector<16x32xf32>
    %336 = arith.addf %319, %335 : vector<16x32xf32>
    %c1_138 = arith.constant 1 : index
    %c0_139 = arith.constant 0 : index
    %c0_140 = arith.constant 0 : index
    %337 = vector.load %arg14[%c1_138, %c0_139, %c0_140] : memref<2x1x32xf32, #tpu.memory_space<vmem>>, vector<1x1x32xf32>
    %338 = vector.shape_cast %337 : vector<1x1x32xf32> to vector<1x32xf32>
    %c1_141 = arith.constant 1 : index
    %c0_142 = arith.constant 0 : index
    %c0_143 = arith.constant 0 : index
    %339 = vector.load %arg15[%c1_141, %c0_142, %c0_143] : memref<2x1x32xf32, #tpu.memory_space<vmem>>, vector<1x1x32xf32>
    %340 = vector.shape_cast %339 : vector<1x1x32xf32> to vector<1x32xf32>
    %cst_144 = arith.constant dense<0.000000e+00> : vector<16xf32>
    %341 = vector.multi_reduction <add>, %336, %cst_144 [1] : vector<16x32xf32> to vector<16xf32>
    %342 = vector.shape_cast %341 : vector<16xf32> to vector<16x1xf32>
    %cst_145 = arith.constant 3.200000e+01 : f32
    %343 = vector.broadcast %cst_145 : f32 to vector<16x1xf32>
    %344 = arith.divf %342, %343 : vector<16x1xf32>
    %345 = vector.broadcast %344 : vector<16x1xf32> to vector<16x32xf32>
    %346 = arith.subf %336, %345 : vector<16x32xf32>
    %347 = arith.mulf %346, %346 : vector<16x32xf32>
    %cst_146 = arith.constant dense<0.000000e+00> : vector<16xf32>
    %348 = vector.multi_reduction <add>, %347, %cst_146 [1] : vector<16x32xf32> to vector<16xf32>
    %349 = vector.shape_cast %348 : vector<16xf32> to vector<16x1xf32>
    %cst_147 = arith.constant 3.200000e+01 : f32
    %350 = vector.broadcast %cst_147 : f32 to vector<16x1xf32>
    %351 = arith.divf %349, %350 : vector<16x1xf32>
    %352 = vector.broadcast %344 : vector<16x1xf32> to vector<16x32xf32>
    %353 = arith.subf %336, %352 : vector<16x32xf32>
    %cst_148 = arith.constant 9.99999974E-6 : f32
    %354 = vector.broadcast %cst_148 : f32 to vector<16x1xf32>
    %355 = arith.addf %351, %354 : vector<16x1xf32>
    %356 = math.rsqrt %355 : vector<16x1xf32>
    %357 = vector.broadcast %356 : vector<16x1xf32> to vector<16x32xf32>
    %358 = arith.mulf %353, %357 : vector<16x32xf32>
    %359 = vector.broadcast %338 : vector<1x32xf32> to vector<16x32xf32>
    %360 = arith.mulf %358, %359 : vector<16x32xf32>
    %361 = vector.broadcast %340 : vector<1x32xf32> to vector<16x32xf32>
    %362 = arith.addf %360, %361 : vector<16x32xf32>
    %363 = vector.shape_cast %362 : vector<16x32xf32> to vector<2x8x32xf32>
    %cst_149 = arith.constant dense<0.000000e+00> : vector<2x32xf32>
    %364 = vector.multi_reduction <add>, %363, %cst_149 [1] : vector<2x8x32xf32> to vector<2x32xf32>
    %cst_150 = arith.constant 8.000000e+00 : f32
    %365 = vector.broadcast %cst_150 : f32 to vector<2x32xf32>
    %366 = arith.divf %364, %365 : vector<2x32xf32>
    %c0_151 = arith.constant 0 : index
    %c0_152 = arith.constant 0 : index
    %367 = vector.load %arg16[%c0_151, %c0_152] : memref<32x1xf32, #tpu.memory_space<vmem>>, vector<32x1xf32>
    %cst_153 = arith.constant dense<0.000000e+00> : vector<2x1xf32>
    %368 = tpu.matmul %366, %367, %cst_153 {dimension_numbers = #tpu.dot_dimension_numbers<[1], [0], [0], [1], [0, 0, 1, 1], [], []>} : vector<2x32xf32>, vector<32x1xf32>, vector<2x1xf32> -> vector<2x1xf32>
    %c0_154 = arith.constant 0 : index
    %c0_155 = arith.constant 0 : index
    %369 = vector.load %arg17[%c0_154, %c0_155] : memref<1x1xf32, #tpu.memory_space<vmem>>, vector<1x1xf32>
    %370 = vector.broadcast %369 : vector<1x1xf32> to vector<2x1xf32>
    %371 = arith.addf %368, %370 : vector<2x1xf32>
    %c0_156 = arith.constant 0 : index
    %c0_157 = arith.constant 0 : index
    %372 = vector.load %arg18[%c0_156, %c0_157] : memref<2x1xf32, #tpu.memory_space<vmem>>, vector<2x1xf32>
    tpu.vector_store %arg18[%c0_156, %c0_157], %371 {strides = array<i32>} : memref<2x1xf32, #tpu.memory_space<vmem>>, vector<2x1xf32>,
    return
  }
}

</mosaic_0001>

<bundles_post_ra>
// kernel: tpu_custom_call.1
= control target key start
LH: loop header
LB: loop body
LE: loop exit
PB: predicated region body
PF: predicated region fallthrough
CT: control target
= control target key end

     0   :  { %s3139_s0 = inlined_call_operand.vmem [shape: f32[2,8,4], index: 0, kind: input, shape index: {}]   ;;  %s3140_s1 = inlined_call_operand.vmem [shape: f32[4,32], index: 1, kind: input, shape index: {}]   ;;  %s3141_s2 = inlined_call_operand.hbm [shape: f32[1,32], index: 2, kind: input, shape index: {}]   ;;  %s3142_s3 = inlined_call_operand.hbm [shape: f32[8,32], index: 3, kind: input, shape index: {}]   ;;  %s3143_s4 = inlined_call_operand.vmem [shape: f32[2,32,96], index: 4, kind: input, shape index: {}]   ;;  %s3144_s5 = inlined_call_operand.vmem [shape: f32[2,1,96], index: 5, kind: input, shape index: {}]   ;;  %s3145_s6 = inlined_call_operand.vmem [shape: f32[2,32,32], index: 6, kind: input, shape index: {}]   ;;  %s3146_s7 = inlined_call_operand.hbm [shape: f32[2,1,32], index: 7, kind: input, shape index: {}]   ;;  %s3147_s8 = inlined_call_operand.hbm [shape: f32[2,1,32], index: 8, kind: input, shape index: {}]   ;;  %s3148_s9 = inlined_call_operand.hbm [shape: f32[2,1,32], index: 9, kind: input, shape index: {}]   ;;  %s3149_s10 = inlined_call_operand.vmem [shape: f32[2,32,64], index: 10, kind: input, shape index: {}]   ;;  %s3150_s11 = inlined_call_operand.hbm [shape: f32[2,1,64], index: 11, kind: input, shape index: {}]   ;;  %s3151_s12 = inlined_call_operand.vmem [shape: f32[2,64,32], index: 12, kind: input, shape index: {}]   ;;  %s3152_s13 = inlined_call_operand.hbm [shape: f32[2,1,32], index: 13, kind: input, shape index: {}]   ;;  %s3153_s14 = inlined_call_operand.hbm [shape: f32[2,1,32], index: 14, kind: input, shape index: {}]   ;;  %s3154_s15 = inlined_call_operand.hbm [shape: f32[2,1,32], index: 15, kind: input, shape index: {}]   ;;  %s3155_s16 = inlined_call_operand.vmem [shape: f32[32,1], index: 16, kind: input, shape index: {}]   ;;  %s3156_s17 = inlined_call_operand.<no memory space> [shape: f32[1,1], index: 17, kind: input, shape index: {}]   ;;  %s3157_s18 = inlined_call_operand.vmem [shape: f32[2,1], index: 18, kind: output, shape index: {}]  }
   0x1   :  { %3159 = sst [smem:[#allocation22_spill]] %s3139_s0  ;;  %v23_v0 = vstv %s3156_s17 }
   0x2   :  { %3160 = sst [smem:[#allocation23_spill]] %s3140_s1  ;;  %24 = vst [vmem:[#allocation2] sm:$0x1] %v23_v0 }
   0x3   :  { %3161 = sst [smem:[#allocation24_spill]] %s3141_s2 }
   0x4   :  { %25 = vsyncpa [#allocation4], 0 }
   0x5   :  { %26 = vsyncpa [#allocation6], 0 }
   0x6   :  { %27 = vsyncpa [#allocation9], 0 }
   0x7   :  { %28 = vsyncpa [#allocation12], 0  ;;  %s50_s0 = sshll.u32 %s3142_s3, 4  ;;  %s51_s0 = int_to_ptr.hbm [resolvable:$true] %s50_s0 }
   0x8   :  { %29 = vsyncpa [#allocation15], 0  ;;  %s2546_s19 = smov [#allocation5]   ;;  %s79_s22 = sshll.u32 %s3147_s8, 4  ;;  %s80_s22 = int_to_ptr.hbm [resolvable:$true] %s79_s22 }
   0x9   :  { %s52_s1 = sshll.u32 %s2546_s19, 4  ;;  %s2547_s17 = smov [#allocation8]   ;;  %s53_s1 = int_to_ptr.vmem [resolvable:$true] %s52_s1 }
   0xa   :  { %55 = dma.hbm_to_vmem [thread:$0]  %s51_s0, 128, %s53_s1, [#allocation6]  }
   0xb   :  { %s81_s2 = sshll.u32 %s2547_s17, 4  ;;  %s107_s25 = sshll.u32 %s3150_s11, 4  ;;  %s82_s2 = int_to_ptr.vmem [resolvable:$true] %s81_s2  ;;  %s108_s25 = int_to_ptr.hbm [resolvable:$true] %s107_s25 }
   0xc   :  { %s2548_s3 = smov 16   ;;  %s2549_s26 = smov 1  }
   0xd   :  { %87 = dma.hbm_to_vmem [thread:$0]  %s80_s22, 32, %s82_s2, [#allocation9], %s2548_s3, %s2548_s3, %s2549_s26  }
   0xe   :  { %s135_s29 = sshll.u32 %s3153_s14, 4  ;;  %s2550_s8 = smov [#allocation11]   ;;  %s136_s29 = int_to_ptr.hbm [resolvable:$true] %s135_s29 }
   0xf   :  { %s109_s30 = sshll.u32 %s2550_s8, 4  ;;  %s2551_s11 = smov [#allocation14]   ;;  %s110_s30 = int_to_ptr.vmem [resolvable:$true] %s109_s30 }
  0x10   :  { %115 = dma.hbm_to_vmem [thread:$0]  %s108_s25, 32, %s110_s30, [#allocation12], %s2548_s3, %s2548_s3, %s2549_s26  }
  0x11   :  { %s137_s0 = sshll.u32 %s2551_s11, 4  ;;  %s3162_s20 = sld [smem:[#allocation24_spill]]  ;;  %s138_s0 = int_to_ptr.vmem [resolvable:$true] %s137_s0 }
  0x12   :  { %143 = dma.hbm_to_vmem [thread:$0]  %s136_s29, 32, %s138_s0, [#allocation15], %s2548_s3, %s2548_s3, %s2549_s26  }
  0x13   :  { %s66_s17 = sshll.u32 %s3146_s7, 4  ;;  %s2552_s2 = smov [#allocation3]   ;;  %s67_s17 = int_to_ptr.hbm [resolvable:$true] %s66_s17 }
  0x14   :  { %s41_s23 = sshll.u32 %s2552_s2, 4  ;;  %s2553_s24 = smov [#allocation7]   ;;  %s42_s23 = int_to_ptr.vmem [resolvable:$true] %s41_s23 }
  0x15   :  { %s68_s25 = sshll.u32 %s2553_s24, 4  ;;  %s92_s8 = sshll.u32 %s3148_s9, 4  ;;  %s69_s25 = int_to_ptr.vmem [resolvable:$true] %s68_s25  ;;  %s93_s8 = int_to_ptr.hbm [resolvable:$true] %s92_s8 }
  0x16   :  { %74 = dma.hbm_to_vmem [thread:$0]  %s67_s17, 32, %s69_s25, [#allocation6], %s2548_s3, %s2548_s3, %s2549_s26  }
  0x17   :  { %s39_s21 = sshll.u32 %s3162_s20, 4  ;;  %s122_s7 = sshll.u32 %s3152_s13, 4  ;;  %s40_s21 = int_to_ptr.hbm [resolvable:$true] %s39_s21  ;;  %s123_s7 = int_to_ptr.hbm [resolvable:$true] %s122_s7 }
  0x18   :  { %44 = dma.hbm_to_vmem [thread:$0]  %s40_s21, 16, %s42_s23, [#allocation4]  }
  0x19   :  { %s2554_s11 = smov [#allocation10]   ;;  %s2555_s19 = smov [#allocation13]  }
  0x1a   :  { %s94_s0 = sshll.u32 %s2554_s11, 4  ;;  %s124_s9 = sshll.u32 %s2555_s19, 4  ;;  %s95_s0 = int_to_ptr.vmem [resolvable:$true] %s94_s0  ;;  %s125_s9 = int_to_ptr.vmem [resolvable:$true] %s124_s9 }
  0x1b   :  { %100 = dma.hbm_to_vmem [thread:$0]  %s93_s8, 32, %s95_s0, [#allocation9], %s2548_s3, %s2548_s3, %s2549_s26  }
  0x1c   :  { %s148_s21 = sshll.u32 %s3154_s15, 4  ;;  %s2556_s13 = smov [#allocation16]   ;;  %s149_s21 = int_to_ptr.hbm [resolvable:$true] %s148_s21 }
  0x1d   :  { %130 = dma.hbm_to_vmem [thread:$0]  %s123_s7, 32, %s125_s9, [#allocation12], %s2548_s3, %s2548_s3, %s2549_s26  }
  0x1e   :  { %s150_s14 = sshll.u32 %s2556_s13, 4  ;;  %s151_s14 = int_to_ptr.vmem [resolvable:$true] %s150_s14 }
  0x1f   :  { %156 = dma.hbm_to_vmem [thread:$0]  %s149_s21, 32, %s151_s14, [#allocation15], %s2548_s3, %s2548_s3, %s2549_s26  }
  0x20   :  { %2536 = dma.done.wait [#allocation4], 16  }
  0x21   :  { %2537 = vsyncadd [#allocation4], 4294967280 }
  0x22   :  { %2538 = dma.done.wait [#allocation6], 160  }
  0x23   :  { %2539 = vsyncadd [#allocation6], 4294967136 }
  0x24   :  { %2540 = dma.done.wait [#allocation9], 64  }
  0x25   :  { %2541 = vsyncadd [#allocation9], 4294967232 }
  0x26   :  { %2542 = dma.done.wait [#allocation12], 64  }
  0x27   :  { %2543 = vsyncadd [#allocation12], 4294967232 }
  0x28   :  { %2544 = dma.done.wait [#allocation15], 64  }
  0x29   :  { %2545 = vsyncadd [#allocation15], 4294967232  ;;  %vm211_vm0 = vcmask 1043456   ;;  %vm204_vm1 = vcmask 31744   ;;  %s3163_s17 = sld [smem:[#allocation23_spill]]  ;;  %v244_v3 = vld [vmem:[%s3143_s4 + $0x18] sm:$0xff] }
  0x2a   :  { %s3164_s24 = sld [smem:[#allocation22_spill]]  ;;  %268 = vmatpush.msra.mxu1 %v244_v3  ;;  %v243_v5 = vld [vmem:[%s3143_s4 + $0x10] sm:$0xff]  ;;  %v242_v6 = vld [vmem:[%s3143_s4 + $0x8] sm:$0xff]  ;;  %v241_v7 = vld [vmem:[%s3143_s4] sm:$0xff]  ;;  %vm249_vm2 = vcmask 261120   ;;  %s2557_s9 = smov 88  }
  0x2b   :  { %v2218_v8 = vld [vmem:[#allocation3] ss:$0 sm:$0xff]  ;;  %v238_v10 = vld [vmem:[#allocation5] sm:$0xff]  ;;  %v2219_v16 = vld [vmem:[%s3144_s5] ss:$0 sm:$0xff]  ;;  %s2558_s1 = smov 96  }
  0x2c   :  { %269 = vmatpush.msra.mxu1 %v243_v5  ;;  %s2559_s20 = smov 120   ;;  %s2560_s21 = smov 64   ;;  %vm286_vm3 = vcmask 64512   ;;  %v279_v55 = vld [vmem:[%s3145_s6] sm:$0xff]  ;;  %v280_v5 = vld [vmem:[%s3145_s6 + $0x8] sm:$0xff]  ;;  %vm1044_vm11 = vcmask 523264  }
  0x2d   :  { %s2561_s13 = smov 112   ;;  %s2562_s14 = smov 56  }
  0x2e   :  { %270 = vmatpush.msra.mxu1 %v242_v6  ;;  %s2563_s15 = smov 80   ;;  %s2564_s22 = smov 72  }
  0x2f   :  { %v199_v1 = vld [vmem:[%s3163_s17] sm:$0xf]  ;;  %s2565_s23 = smov 104   ;;  %s2566_s26 = smov 48  }
  0x30   :  { %v197_v2 = vld [vmem:[%s3164_s24] sm:$0xff]  ;;  %2093 = vmatpush.msk.msra.mxu0 %vm211_vm0, %v199_v1  ;;  %v198_v4 = vld [vmem:[%s3164_s24 + $0x8] sm:$0xff]  ;;  %271 = vmatpush.msra.mxu1 %v241_v7  ;;  %s2567_s25 = smov 40  }
  0x31   :  { %2094 = vmatmul.msk.f32.vlgmr.msra.gmra.mxu0 %vm204_vm1, %v197_v2 }
  0x39   :  { %2095 = vmatmul.msk.f32.gmra.mxu0 %vm204_vm1, %v198_v4 }
  0xae   :  { %v232_v9 = vpop.f32.mrf.mxu0 }
  0xaf   :  { %v233_v11 = vadd.f32 %v2218_v8, %v232_v9 }
  0xb1   :  { %v2737_v12 = vadd.f32 %v238_v10, %v233_v11 }
  0xb3   :  { %2096 = vmatmul.msk.f32.vlgmr.msra.gmra.mxu1 %vm249_vm2, %v2737_v12 }
  0xb6   :  { %v235_v13 = vpop.f32.mrf.mxu0 }
  0xb7   :  { %v236_v14 = vadd.f32 %v2218_v8, %v235_v13 }
  0xb9   :  { %v2741_v15 = vadd.f32 %v238_v10, %v236_v14 }
  0xbb   :  { %2097 = vmatmul.msk.f32.gmra.mxu1 %vm249_vm2, %v2741_v15 }
 0x130   :  { %v273_v17 = vpop.f32.mrf.mxu1 }
 0x131   :  { %v2748_v18 = vadd.f32 %v2219_v16, %v273_v17 }
 0x133   :  { %414 = vrot.lane.b32.xlu1 %v2748_v18, %s2557_s9  ;;  %284 = vrot.lane.b32.xlu0 %v2748_v18, %s2558_s1 }
 0x138   :  { %v276_v19 = vpop.f32.mrf.mxu1 }
 0x139   :  { %v2754_v20 = vadd.f32 %v2219_v16, %v276_v19 }
 0x13b   :  { %412 = vrot.lane.b32.xlu1 %v2748_v18, %s2559_s20  ;;  %312 = vrot.lane.b32.xlu0 %v2754_v20, %s2558_s1 }
 0x143   :  { %360 = vrot.lane.b32.xlu0 %v2748_v18, %s2560_s21  ;;  %442 = vrot.lane.b32.xlu1 %v2754_v20, %s2557_s9 }
 0x1a5   :  { %v415_v21 = vpop.permute.xlu1 %414  ;;  %v285_v22 = vpop.permute.xlu0 %284 }
 0x1a6   :  { %2098 = vmatpush.xpose.msk.msra.mxu2 %vm286_vm3, %v285_v22  ;;  %2104 = vmatpush.xpose.msk.msrb.mxu0 %vm286_vm3, %v415_v21 }
 0x1a9   :  { %2099 = vmatmul.msk.f32.vlgmr.msra.gmra.mxu2 %vm286_vm3, %v2748_v18 }
 0x1aa   :  { %563 = vmatpush.msra.mxu0 %v280_v5 }
 0x1ad   :  { %v413_v23 = vpop.permute.xlu1 %412  ;;  %v313_v24 = vpop.permute.xlu0 %312 }
 0x1ae   :  { %2100 = vmatpush.xpose.msk.msra.mxu3 %vm286_vm3, %v313_v24  ;;  %2105 = vmatmul.msk.f32.vlgmr.msrb.gmra.mxu0 %vm286_vm3, %v413_v23 }
 0x1b1   :  { %2101 = vmatmul.msk.f32.vlgmr.msra.gmra.mxu3 %vm286_vm3, %v2754_v20 }
 0x1b5   :  { %v361_v25 = vpop.permute.xlu0 %360  ;;  %v443_v30 = vpop.permute.xlu1 %442 }
 0x1b6   :  { %381 = vmatpush.msrb.mxu2 %v361_v25 }
 0x1b8   :  { %2106 = vmatpush.xpose.msk.msra.mxu2 %vm286_vm3, %v443_v30 }
 0x22b   :  { %v437_v26 = vpop.f32.mrf.mxu0 }
 0x22c   :  { %v308_v27 = vpop.f32.mrf.mxu2  ;;  %v468_v28 = vsel %vm286_vm3, %v437_v26, -inf }
 0x22d   :  { %469 = vmax.xlane.f32.xlu1 %v468_v28  ;;  %v338_v29 = vsel %vm286_vm3, %v308_v27, -inf }
 0x22e   :  { %339 = vmax.xlane.f32.xlu2 %v338_v29 }
 0x234   :  { %v335_v31 = vpop.f32.mrf.mxu3 }
 0x235   :  { %v341_v32 = vsel %vm286_vm3, %v335_v31, -inf }
 0x236   :  { %342 = vmax.xlane.f32.xlu0 %v341_v32 }
 0x246   :  { %386 = vrot.lane.b32.xlu1 %v2754_v20, %s2560_s21 }
 0x24e   :  { %600 = vrot.lane.b32.xlu1 %v2748_v18, %s2561_s13 }
 0x2a0   :  { %v470_v33 = vpop.xlane.xlu1 %469 }
 0x2a1   :  { %v474_v34 = vsub.f32 %v437_v26, %v470_v33  ;;  %v340_v35 = vpop.xlane.xlu2 %339 }
 0x2a2   :  { %v344_v36 = vsub.f32 %v308_v27, %v340_v35 }
 0x2a3   :  { %v476_v37 = vmul.f32 1.442695, %v474_v34 }
 0x2a4   :  { %v346_v38 = vmul.f32 1.442695, %v344_v36 }
 0x2a5   :  { %2236 = vpow2.f32 %v476_v37 }
 0x2a6   :  { %2238 = vpow2.f32 %v346_v38 }
 0x2a9   :  { %v343_v44 = vpop.xlane.xlu0 %342 }
 0x2aa   :  { %v345_v45 = vsub.f32 %v335_v31, %v343_v44 }
 0x2ab   :  { %v2237_v39 = vpop.eup %2236 }
 0x2ac   :  { %v2239_v40 = vpop.eup %2238  ;;  %v480_v41 = vsel %vm286_vm3, %v2237_v39, 0.0  ;;  %v348_v46 = vmul.f32 1.442695, %v345_v45 }
 0x2ad   :  { %481 = vadd.xlane.f32.xlu0 %v480_v41  ;;  %v350_v42 = vsel %vm286_vm3, %v2239_v40, 0.0 }
 0x2ae   :  { %351 = vadd.xlane.f32.xlu2 %v350_v42  ;;  %2240 = vpow2.f32 %v348_v46 }
 0x2b4   :  { %v2241_v47 = vpop.eup %2240 }
 0x2b5   :  { %v353_v48 = vsel %vm286_vm3, %v2241_v47, 0.0 }
 0x2b8   :  { %v387_v43 = vpop.permute.xlu1 %386 }
 0x2b9   :  { %407 = vmatpush.msrb.mxu3 %v387_v43 }
 0x2c0   :  { %v601_v0 = vpop.permute.xlu1 %600 }
 0x2c1   :  { %490 = vrot.lane.b32.xlu0 %v2748_v18, %s2562_s14 }
 0x2c6   :  { %440 = vrot.lane.b32.xlu2 %v2754_v20, %s2559_s20 }
 0x2ef   :  { %354 = vadd.xlane.f32.xlu2 %v353_v48 }
 0x307   :  { %602 = vrot.lane.b32.xlu2 %v2748_v18, %s2563_s15 }
 0x30f   :  { %516 = vrot.lane.b32.xlu2 %v2754_v20, %s2562_s14 }
 0x317   :  { %630 = vrot.lane.b32.xlu2 %v2754_v20, %s2563_s15 }
 0x31f   :  { %763 = vrot.lane.b32.xlu2 %v2748_v18, %s2564_s22 }
 0x320   :  { %v482_v52 = vpop.xlane.xlu0 %481 }
 0x321   :  { %v352_v49 = vpop.xlane.xlu2 %351 }
 0x322   :  { %2242 = vrcp.f32 %v352_v49 }
 0x327   :  { %628 = vrot.lane.b32.xlu2 %v2754_v20, %s2561_s13 }
 0x328   :  { %v2243_v50 = vpop.eup %2242 }
 0x329   :  { %v358_v51 = vmul.f32 %v2243_v50, %v2239_v40  ;;  %v441_v53 = vpop.permute.xlu2 %440 }
 0x32b   :  { %2102 = vmatmul.msk.f32.vlgmr.msrb.gmra.mxu2 %vm286_vm3, %v358_v51 }
 0x32c   :  { %592 = vmatpush.msrb.mxu2 %v279_v55 }
 0x333   :  { %2107 = vmatmul.msk.f32.vlgmr.msra.gmra.mxu2 %vm286_vm3, %v441_v53  ;;  %v491_v54 = vpop.permute.xlu0 %490 }
 0x334   :  { %511 = vmatpush.msra.mxu3 %v491_v54 }
 0x362   :  { %v355_v56 = vpop.xlane.xlu2 %354 }
 0x363   :  { %2244 = vrcp.f32 %v355_v56 }
 0x364   :  { %2246 = vrcp.f32 %v482_v52 }
 0x369   :  { %v2245_v57 = vpop.eup %2244 }
 0x36a   :  { %v603_v58 = vpop.permute.xlu2 %602  ;;  %v359_v59 = vmul.f32 %v2245_v57, %v2241_v47  ;;  %v2247_v60 = vpop.eup %2246  ;;  %v281_v47 = vld [vmem:[%s3145_s6 + $0x10] sm:$0xff] }
 0x36b   :  { %v488_v61 = vmul.f32 %v2247_v60, %v2237_v39  ;;  %751 = vmatpush.msrb.mxu0 %v281_v47 }
 0x36c   :  { %2103 = vmatmul.msk.f32.vlgmr.msrb.gmra.mxu3 %vm286_vm3, %v359_v59 }
 0x36d   :  { %2114 = vmatpush.xpose.msk.msrb.mxu3 %vm286_vm3, %v603_v58 }
 0x372   :  { %v517_v62 = vpop.permute.xlu2 %516 }
 0x373   :  { %537 = vmatpush.msrb.mxu1 %v517_v62 }
 0x374   :  { %2108 = vmatmul.msk.f32.vlgmr.msra.gmra.mxu3 %vm286_vm3, %v488_v61 }
 0x37a   :  { %v631_v63 = vpop.permute.xlu2 %630 }
 0x37b   :  { %2116 = vmatpush.xpose.msk.msra.mxu1 %vm286_vm3, %v631_v63 }
 0x37c   :  { %2115 = vmatmul.msk.f32.vlgmr.msrb.gmra.mxu3 %vm286_vm3, %v601_v0 }
 0x382   :  { %v764_v1 = vpop.permute.xlu2 %763 }
 0x383   :  { %2122 = vmatpush.xpose.msk.msra.mxu2 %vm286_vm3, %v764_v1 }
 0x38a   :  { %v629_v19 = vpop.permute.xlu2 %628 }
 0x3ae   :  { %v383_v2 = vpop.f32.mrf.mxu2 }
 0x3af   :  { %2112 = vmatmul.msk.f32.vlgmr.msrb.gmra.mxu2 %vm286_vm3, %v383_v2 }
 0x3b6   :  { %v465_v3 = vpop.f32.mrf.mxu2 }
 0x3b7   :  { %v471_v4 = vsel %vm286_vm3, %v465_v3, -inf }
 0x3b8   :  { %472 = vmax.xlane.f32.xlu0 %v471_v4 }
 0x3cc   :  { %761 = vrot.lane.b32.xlu0 %v2748_v18, %s2565_s23 }
 0x3d4   :  { %791 = vrot.lane.b32.xlu0 %v2754_v20, %s2564_s22 }
 0x3dc   :  { %789 = vrot.lane.b32.xlu0 %v2754_v20, %s2565_s23 }
 0x3ef   :  { %v409_v6 = vpop.f32.mrf.mxu3 }
 0x3f0   :  { %2113 = vmatmul.msk.f32.gmra.mxu2 %vm286_vm3, %v409_v6 }
 0x3f7   :  { %v513_v7 = vpop.f32.mrf.mxu3 }
 0x3f8   :  { %2110 = vmatmul.msk.f32.vlgmr.msra.gmra.mxu0 %vm286_vm3, %v513_v7  ;;  %v282_v7 = vld [vmem:[%s3145_s6 + $0x18] sm:$0xff] }
 0x3ff   :  { %v625_v8 = vpop.f32.mrf.mxu3 }
 0x400   :  { %v656_v9 = vsel %vm286_vm3, %v625_v8, -inf }
 0x401   :  { %657 = vmax.xlane.f32.xlu2 %v656_v9 }
 0x42b   :  { %v473_v10 = vpop.xlane.xlu0 %472 }
 0x42c   :  { %v475_v11 = vsub.f32 %v465_v3, %v473_v10 }
 0x42e   :  { %v478_v13 = vmul.f32 1.442695, %v475_v11 }
 0x430   :  { %2248 = vpow2.f32 %v478_v13 }
 0x432   :  { %v2827_v28 = vpop.f32.mrf.mxu2 }
 0x436   :  { %v2249_v14 = vpop.eup %2248 }
 0x437   :  { %v483_v16 = vsel %vm286_vm3, %v2249_v14, 0.0 }
 0x438   :  { %484 = vadd.xlane.f32.xlu1 %v483_v16 }
 0x43e   :  { %v762_v17 = vpop.permute.xlu0 %761 }
 0x43f   :  { %2123 = vmatmul.msk.f32.vlgmr.msra.gmra.mxu2 %vm286_vm3, %v762_v17 }
 0x446   :  { %v792_v35 = vpop.permute.xlu0 %791 }
 0x44e   :  { %v790_v38 = vpop.permute.xlu0 %789 }
 0x473   :  { %v2830_v30 = vpop.f32.mrf.mxu2 }
 0x474   :  { %v658_v21 = vpop.xlane.xlu2 %657 }
 0x475   :  { %v662_v22 = vsub.f32 %v625_v8, %v658_v21  ;;  %v565_v11 = vpop.f32.mrf.mxu0 }
 0x476   :  { %v595_v16 = vadd.f32 %v2827_v28, %v565_v11 }
 0x477   :  { %v664_v23 = vmul.f32 1.442695, %v662_v22 }
 0x479   :  { %2250 = vpow2.f32 %v664_v23 }
 0x47f   :  { %v2251_v24 = vpop.eup %2250 }
 0x480   :  { %v668_v25 = vsel %vm286_vm3, %v2251_v24, 0.0 }
 0x481   :  { %669 = vadd.xlane.f32.xlu1 %v668_v25 }
 0x49a   :  { %678 = vrot.lane.b32.xlu1 %v2748_v18, %s2566_s26 }
 0x4ab   :  { %v485_v26 = vpop.xlane.xlu1 %484 }
 0x4ac   :  { %2252 = vrcp.f32 %v485_v26 }
 0x4b2   :  { %v2253_v27 = vpop.eup %2252 }
 0x4b3   :  { %v489_v29 = vmul.f32 %v2253_v27, %v2249_v14 }
 0x4b5   :  { %2109 = vmatmul.msk.f32.vlgmr.msrb.gmra.mxu1 %vm286_vm3, %v489_v29 }
 0x4bd   :  { %2117 = vmatmul.msk.f32.vlgmr.msra.gmra.mxu1 %vm286_vm3, %v629_v19  ;;  %v2220_v19 = vld [vmem:[#allocation7] ss:$0 sm:$0xff] }
 0x4c2   :  { %v786_v31 = vpop.f32.mrf.mxu2 }
 0x4c3   :  { %v817_v32 = vsel %vm286_vm3, %v786_v31, -inf }
 0x4c4   :  { %818 = vmax.xlane.f32.xlu1 %v817_v32 }
 0x4f4   :  { %v670_v33 = vpop.xlane.xlu1 %669 }
 0x4f5   :  { %2254 = vrcp.f32 %v670_v33 }
 0x4fb   :  { %v2255_v34 = vpop.eup %2254 }
 0x4fc   :  { %v676_v36 = vmul.f32 %v2255_v34, %v2251_v24  ;;  %v2568_v34 = vmov 32.0  }
 0x50c   :  { %v679_v37 = vpop.permute.xlu1 %678 }
 0x50d   :  { %699 = vmatpush.msra.mxu3 %v679_v37 }
 0x50e   :  { %2118 = vmatmul.msk.f32.vlgmr.msra.gmra.mxu3 %vm286_vm3, %v676_v36 }
 0x50f   :  { %2124 = vmatpush.xpose.msk.msrb.mxu3 %vm286_vm3, %v792_v35 }
 0x513   :  { %912 = vmatpush.msra.mxu3 %v282_v7  ;;  %v1036_v7 = vld [vmem:[%s3151_s12 + $0x20] sm:$0xff] }
 0x516   :  { %2125 = vmatmul.msk.f32.vlgmr.msrb.gmra.mxu3 %vm286_vm3, %v790_v38 }
 0x532   :  { %v539_v39 = vpop.f32.mrf.mxu1 }
 0x533   :  { %2111 = vmatmul.msk.f32.gmra.mxu0 %vm286_vm3, %v539_v39 }
 0x537   :  { %v819_v40 = vpop.xlane.xlu1 %818 }
 0x538   :  { %v823_v41 = vsub.f32 %v786_v31, %v819_v40 }
 0x53a   :  { %v825_v42 = vmul.f32 1.442695, %v823_v41  ;;  %v653_v43 = vpop.f32.mrf.mxu1 }
 0x53b   :  { %v659_v44 = vsel %vm286_vm3, %v653_v43, -inf }
 0x53c   :  { %2256 = vpow2.f32 %v825_v42  ;;  %660 = vmax.xlane.f32.xlu0 %v659_v44 }
 0x542   :  { %v2257_v45 = vpop.eup %2256 }
 0x543   :  { %v829_v46 = vsel %vm286_vm3, %v2257_v45, 0.0 }
 0x544   :  { %830 = vadd.xlane.f32.xlu2 %v829_v46 }
 0x550   :  { %839 = vrot.lane.b32.xlu0 %v2748_v18, %s2567_s25 }
 0x591   :  { %v701_v48 = vpop.f32.mrf.mxu3 }
 0x592   :  { %2120 = vmatmul.msk.f32.vlgmr.msrb.gmra.mxu0 %vm286_vm3, %v701_v48 }
 0x599   :  { %v814_v49 = vpop.f32.mrf.mxu3 }
 0x59a   :  { %v820_v50 = vsel %vm286_vm3, %v814_v49, -inf }
 0x59b   :  { %821 = vmax.xlane.f32.xlu1 %v820_v50  ;;  %v995_v50 = vld [vmem:[%s3149_s10 + $0x10] sm:$0xff] }
 0x5af   :  { %v661_v51 = vpop.xlane.xlu0 %660 }
 0x5b0   :  { %v663_v52 = vsub.f32 %v653_v43, %v661_v51  ;;  %v568_v13 = vpop.f32.mrf.mxu0  ;;  %v994_v51 = vld [vmem:[%s3149_s10 + $0x8] sm:$0xff] }
 0x5b1   :  { %v598_v27 = vadd.f32 %v2830_v30, %v568_v13 }
 0x5b2   :  { %v666_v53 = vmul.f32 1.442695, %v663_v52  ;;  %v993_v52 = vld [vmem:[%s3149_s10] sm:$0xff] }
 0x5b4   :  { %2258 = vpow2.f32 %v666_v53  ;;  %865 = vrot.lane.b32.xlu1 %v2754_v20, %s2567_s25 }
 0x5b7   :  { %v831_v61 = vpop.xlane.xlu2 %830 }
 0x5ba   :  { %v2259_v18 = vpop.eup %2258 }
 0x5bb   :  { %v671_v54 = vsel %vm286_vm3, %v2259_v18, 0.0 }
 0x5bc   :  { %672 = vadd.xlane.f32.xlu2 %v671_v54 }
 0x5c2   :  { %v840_v2 = vpop.permute.xlu0 %839 }
 0x5d4   :  { %704 = vrot.lane.b32.xlu2 %v2754_v20, %s2566_s26 }
 0x60e   :  { %v822_v55 = vpop.xlane.xlu1 %821 }
 0x60f   :  { %v824_v56 = vsub.f32 %v814_v49, %v822_v55  ;;  %v753_v14 = vpop.f32.mrf.mxu0  ;;  %v996_v49 = vld [vmem:[%s3149_s10 + $0x18] sm:$0xff] }
 0x610   :  { %v759_v17 = vadd.f32 %v753_v14, %v595_v16 }
 0x611   :  { %v827_v57 = vmul.f32 1.442695, %v824_v56 }
 0x613   :  { %2260 = vpow2.f32 %v827_v57 }
 0x619   :  { %v2261_v58 = vpop.eup %2260 }
 0x61a   :  { %v832_v59 = vsel %vm286_vm3, %v2261_v58, 0.0 }
 0x61b   :  { %833 = vadd.xlane.f32.xlu2 %v832_v59 }
 0x626   :  { %v866_v60 = vpop.permute.xlu1 %865 }
 0x627   :  { %886 = vmatpush.msrb.mxu2 %v866_v60 }
 0x62f   :  { %v673_v62 = vpop.xlane.xlu2 %672 }
 0x630   :  { %2262 = vrcp.f32 %v673_v62 }
 0x631   :  { %2264 = vrcp.f32 %v831_v61  ;;  %v2221_v61 = vld [vmem:[#allocation8] ss:$0 sm:$0xff] }
 0x636   :  { %v2263_v63 = vpop.eup %2262 }
 0x637   :  { %v677_v0 = vmul.f32 %v2263_v63, %v2259_v18  ;;  %v705_v1 = vpop.permute.xlu2 %704  ;;  %v2265_v20 = vpop.eup %2264 }
 0x638   :  { %725 = vmatpush.msrb.mxu1 %v705_v1  ;;  %v837_v3 = vmul.f32 %v2265_v20, %v2257_v45  ;;  %v1039_v20 = vld [vmem:[%s3151_s12 + $0x38] sm:$0xff] }
 0x639   :  { %2119 = vmatmul.msk.f32.vlgmr.msrb.gmra.mxu1 %vm286_vm3, %v677_v0  ;;  %v2222_v0 = vld [vmem:[#allocation10] ss:$0 sm:$0xff]  ;;  %1059 = vmatpush.msra.mxu0 %v1039_v20  ;;  %v2226_v20 = vld [vmem:[#allocation16] ss:$0 sm:$0xff] }
 0x63a   :  { %860 = vmatpush.msra.mxu1 %v840_v2 }
 0x63c   :  { %1019 = vmatpush.msrb.mxu1 %v996_v49 }
 0x63e   :  { %1020 = vmatpush.msrb.mxu1 %v995_v50 }
 0x640   :  { %1021 = vmatpush.msrb.mxu1 %v994_v51 }
 0x641   :  { %2126 = vmatmul.msk.f32.vlgmr.msra.gmra.mxu1 %vm286_vm3, %v837_v3  ;;  %v1038_v3 = vld [vmem:[%s3151_s12 + $0x30] sm:$0xff] }
 0x642   :  { %1022 = vmatpush.msrb.mxu1 %v993_v52  ;;  %1060 = vmatpush.msra.mxu0 %v1038_v3  ;;  %v2137_v52 = vld [vmem:[%s3143_s4 + $0x38] sm:$0xff] }
 0x643   :  { %1160 = vmatpush.msra.mxu2 %v2137_v52 }
 0x68e   :  { %v834_v4 = vpop.xlane.xlu2 %833 }
 0x68f   :  { %2266 = vrcp.f32 %v834_v4  ;;  %v1037_v4 = vld [vmem:[%s3151_s12 + $0x28] sm:$0xff] }
 0x690   :  { %2268 = vrcp.f32 %v2568_v34  ;;  %1061 = vmatpush.msra.mxu0 %v1037_v4 }
 0x692   :  { %1062 = vmatpush.msra.mxu0 %v1036_v7 }
 0x695   :  { %v2267_v5 = vpop.eup %2266 }
 0x696   :  { %v838_v6 = vmul.f32 %v2267_v5, %v2261_v58  ;;  %v2269_v36 = vpop.eup %2268 }
 0x697   :  { %v939_v37 = vmul.f32 32.0, %v2269_v36  ;;  %vm943_vm4 = vweird.f32 %v2269_v36 }
 0x698   :  { %2127 = vmatmul.msk.f32.vlgmr.msrb.gmra.mxu2 %vm286_vm3, %v838_v6 }
 0x6b6   :  { %v727_v8 = vpop.f32.mrf.mxu1 }
 0x6b7   :  { %2121 = vmatmul.msk.f32.gmra.mxu0 %vm286_vm3, %v727_v8 }
 0x6be   :  { %v862_v9 = vpop.f32.mrf.mxu1 }
 0x6bf   :  { %2128 = vmatmul.msk.f32.vlgmr.msra.gmra.mxu3 %vm286_vm3, %v862_v9  ;;  %v1035_v9 = vld [vmem:[%s3151_s12 + $0x18] sm:$0xff] }
 0x6c0   :  { %1063 = vmatpush.msra.mxu0 %v1035_v9 }
 0x71b   :  { %v888_v10 = vpop.f32.mrf.mxu2 }
 0x71c   :  { %2129 = vmatmul.msk.f32.gmra.mxu3 %vm286_vm3, %v888_v10 }
 0x734   :  { %v756_v26 = vpop.f32.mrf.mxu0 }
 0x735   :  { %v760_v29 = vadd.f32 %v756_v26, %v598_v27  ;;  %v1032_v26 = vld [vmem:[%s3151_s12] sm:$0xff]  ;;  %v2223_v27 = vld [vmem:[#allocation11] ss:$0 sm:$0xff] }
 0x742   :  { %v914_v21 = vpop.f32.mrf.mxu3 }
 0x743   :  { %v920_v22 = vadd.f32 %v914_v21, %v759_v17 }
 0x745   :  { %v926_v23 = vadd.f32 %v2220_v19, %v920_v22 }
 0x747   :  { %v928_v24 = vadd.f32 %v926_v23, %v2737_v12  ;;  %v940_v12 = vsub.f32 1.0, %v939_v37 }
 0x749   :  { %v932_v25 = vsel %vm249_vm2, %v928_v24, 0.0  ;;  %v941_v38 = vmul.f32 %v2269_v36, %v940_v12 }
 0x74a   :  { %933 = vadd.xlane.f32.xlu0 %v932_v25  ;;  %v1033_v25 = vld [vmem:[%s3151_s12 + $0x8] sm:$0xff] }
 0x74b   :  { %v942_v39 = vadd.f32 %v2269_v36, %v941_v38 }
 0x74d   :  { %v2868_v40 = vsel %vm943_vm4, %v2269_v36, %v942_v39 }
 0x79f   :  { %v917_v31 = vpop.f32.mrf.mxu3 }
 0x7a0   :  { %v921_v32 = vadd.f32 %v917_v31, %v760_v29 }
 0x7a2   :  { %v927_v33 = vadd.f32 %v2220_v19, %v921_v32 }
 0x7a4   :  { %v929_v28 = vadd.f32 %v927_v33, %v2741_v15 }
 0x7a6   :  { %v935_v35 = vsel %vm249_vm2, %v929_v28, 0.0 }
 0x7a7   :  { %936 = vadd.xlane.f32.xlu2 %v935_v35  ;;  %v2224_v35 = vld [vmem:[#allocation13] ss:$0 sm:$0xff] }
 0x7bd   :  { %v934_v30 = vpop.xlane.xlu0 %933 }
 0x7be   :  { %v945_v41 = vmul.f32 %v2868_v40, %v934_v30 }
 0x7c0   :  { %v947_v42 = vsub.f32 %v928_v24, %v945_v41  ;;  %v1034_v24 = vld [vmem:[%s3151_s12 + $0x10] sm:$0xff] }
 0x7c1   :  { %1064 = vmatpush.msra.mxu0 %v1034_v24 }
 0x7c2   :  { %v949_v43 = vmul.f32 %v947_v42, %v947_v42 }
 0x7c3   :  { %1065 = vmatpush.msra.mxu0 %v1033_v25 }
 0x7c4   :  { %v951_v44 = vsel %vm249_vm2, %v949_v43, 0.0 }
 0x7c5   :  { %952 = vadd.xlane.f32.xlu1 %v951_v44  ;;  %1066 = vmatpush.msra.mxu0 %v1032_v26 }
 0x81a   :  { %v937_v15 = vpop.xlane.xlu2 %936 }
 0x81b   :  { %v946_v45 = vmul.f32 %v2868_v40, %v937_v15 }
 0x81d   :  { %v948_v46 = vsub.f32 %v929_v28, %v946_v45 }
 0x81f   :  { %v950_v47 = vmul.f32 %v948_v46, %v948_v46 }
 0x821   :  { %v954_v48 = vsel %vm249_vm2, %v950_v47, 0.0 }
 0x822   :  { %955 = vadd.xlane.f32.xlu2 %v954_v48 }
 0x838   :  { %v953_v53 = vpop.xlane.xlu1 %952 }
 0x839   :  { %v957_v18 = vmul.f32 %v953_v53, %v2868_v40  ;;  %v2136_v53 = vld [vmem:[%s3143_s4 + $0x30] sm:$0xff] }
 0x83a   :  { %1161 = vmatpush.msra.mxu2 %v2136_v53 }
 0x83b   :  { %v959_v54 = vadd.f32 1e-05, %v957_v18  ;;  %v2135_v18 = vld [vmem:[%s3143_s4 + $0x28] sm:$0xff] }
 0x83c   :  { %1162 = vmatpush.msra.mxu2 %v2135_v18 }
 0x83d   :  { %2270 = vrsqrt.f32 %v959_v54  ;;  %vm967_vm6 = vweird.f32 %v959_v54 }
 0x843   :  { %v2271_v55 = vpop.eup %2270 }
 0x844   :  { %v962_v56 = vmul.f32 %v2271_v55, %v959_v54  ;;  %vm968_vm5 = vweird.f32 %v2271_v55  ;;  %v2134_v54 = vld [vmem:[%s3143_s4 + $0x20] sm:$0xff] }
 0x845   :  { %vm969_vm7 = vmor %vm967_vm6, %vm968_vm5  ;;  %1163 = vmatpush.msra.mxu2 %v2134_v54 }
 0x846   :  { %v963_v57 = vmul.f32 %v2271_v55, %v962_v56 }
 0x848   :  { %v964_v58 = vmul.f32 0.5, %v963_v57 }
 0x84a   :  { %v965_v59 = vsub.f32 1.5, %v964_v58 }
 0x84c   :  { %v966_v60 = vmul.f32 %v2271_v55, %v965_v59 }
 0x84e   :  { %v970_v62 = vsel %vm969_vm7, %v2271_v55, %v966_v60 }
 0x84f   :  { %v981_v63 = vmul.f32 %v970_v62, %v947_v42 }
 0x851   :  { %v986_v1 = vmul.f32 %v2221_v61, %v981_v63 }
 0x853   :  { %v991_v2 = vadd.f32 %v2222_v0, %v986_v1 }
 0x855   :  { %2130 = vmatmul.msk.f32.vlgmr.msrb.gmra.mxu1 %vm249_vm2, %v991_v2 }
 0x895   :  { %v956_v5 = vpop.xlane.xlu2 %955 }
 0x896   :  { %v958_v6 = vmul.f32 %v956_v5, %v2868_v40 }
 0x898   :  { %v960_v8 = vadd.f32 1e-05, %v958_v6 }
 0x89a   :  { %2272 = vrsqrt.f32 %v960_v8  ;;  %vm977_vm9 = vweird.f32 %v960_v8 }
 0x8a0   :  { %v2273_v10 = vpop.eup %2272 }
 0x8a1   :  { %v972_v11 = vmul.f32 %v2273_v10, %v960_v8  ;;  %vm978_vm8 = vweird.f32 %v2273_v10 }
 0x8a2   :  { %vm979_vm10 = vmor %vm977_vm9, %vm978_vm8 }
 0x8a3   :  { %v973_v13 = vmul.f32 %v2273_v10, %v972_v11 }
 0x8a5   :  { %v974_v14 = vmul.f32 0.5, %v973_v13 }
 0x8a7   :  { %v975_v16 = vsub.f32 1.5, %v974_v14 }
 0x8a9   :  { %v976_v17 = vmul.f32 %v2273_v10, %v975_v16 }
 0x8ab   :  { %v980_v19 = vsel %vm979_vm10, %v2273_v10, %v976_v17 }
 0x8ac   :  { %v982_v21 = vmul.f32 %v980_v19, %v948_v46 }
 0x8ae   :  { %v987_v22 = vmul.f32 %v2221_v61, %v982_v21 }
 0x8b0   :  { %v992_v23 = vadd.f32 %v2222_v0, %v987_v22  ;;  %v2225_v0 = vld [vmem:[#allocation14] ss:$0 sm:$0xff]  ;;  %v2227_v22 = vld [vmem:[%s3144_s5 + $0x1] ss:$0 sm:$0xff] }
 0x8b2   :  { %2131 = vmatmul.msk.f32.gmra.mxu1 %vm249_vm2, %v992_v23 }
 0x8d2   :  { %v1024_v29 = vpop.f32.mrf.mxu1 }
 0x8d3   :  { %v1025_v31 = vadd.f32 %v2223_v27, %v1024_v29 }
 0x8d5   :  { %v1030_v32 = vmax.f32 %v1025_v31, 0.0 }
 0x8d7   :  { %2132 = vmatmul.msk.f32.vlgmr.msra.gmra.mxu0 %vm1044_vm11, %v1030_v32 }
 0x92f   :  { %v1027_v33 = vpop.f32.mrf.mxu1 }
 0x930   :  { %v1028_v34 = vadd.f32 %v2223_v27, %v1027_v33 }
 0x932   :  { %v1031_v28 = vmax.f32 %v1028_v34, 0.0 }
 0x934   :  { %2133 = vmatmul.msk.f32.gmra.mxu0 %vm1044_vm11, %v1031_v28 }
 0x954   :  { %v1068_v36 = vpop.f32.mrf.mxu0 }
 0x955   :  { %v1069_v37 = vadd.f32 %v2224_v35, %v1068_v36 }
 0x957   :  { %v1074_v12 = vadd.f32 %v1069_v37, %v991_v2 }
 0x959   :  { %v1078_v38 = vsel %vm249_vm2, %v1074_v12, 0.0 }
 0x95a   :  { %1079 = vadd.xlane.f32.xlu2 %v1078_v38 }
 0x9b1   :  { %v1071_v39 = vpop.f32.mrf.mxu0 }
 0x9b2   :  { %v1072_v30 = vadd.f32 %v2224_v35, %v1071_v39 }
 0x9b4   :  { %v1075_v41 = vadd.f32 %v1072_v30, %v992_v23 }
 0x9b6   :  { %v1081_v42 = vsel %vm249_vm2, %v1075_v41, 0.0 }
 0x9b7   :  { %1082 = vadd.xlane.f32.xlu2 %v1081_v42 }
 0x9cd   :  { %v1080_v43 = vpop.xlane.xlu2 %1079 }
 0x9ce   :  { %v1084_v44 = vmul.f32 %v1080_v43, %v2868_v40 }
 0x9d0   :  { %v1086_v15 = vsub.f32 %v1074_v12, %v1084_v44 }
 0x9d2   :  { %v1088_v45 = vmul.f32 %v1086_v15, %v1086_v15 }
 0x9d4   :  { %v1090_v46 = vsel %vm249_vm2, %v1088_v45, 0.0 }
 0x9d5   :  { %1091 = vadd.xlane.f32.xlu0 %v1090_v46 }
 0xa2a   :  { %v1083_v47 = vpop.xlane.xlu2 %1082 }
 0xa2b   :  { %v1085_v48 = vmul.f32 %v1083_v47, %v2868_v40 }
 0xa2d   :  { %v1087_v49 = vsub.f32 %v1075_v41, %v1085_v48 }
 0xa2f   :  { %v1089_v50 = vmul.f32 %v1087_v49, %v1087_v49 }
 0xa31   :  { %v1093_v51 = vsel %vm249_vm2, %v1089_v50, 0.0 }
 0xa32   :  { %1094 = vadd.xlane.f32.xlu0 %v1093_v51 }
 0xa48   :  { %v1092_v55 = vpop.xlane.xlu0 %1091 }
 0xa49   :  { %v1096_v56 = vmul.f32 %v1092_v55, %v2868_v40 }
 0xa4b   :  { %v1098_v57 = vadd.f32 1e-05, %v1096_v56 }
 0xa4d   :  { %2274 = vrsqrt.f32 %v1098_v57  ;;  %vm1106_vm13 = vweird.f32 %v1098_v57 }
 0xa53   :  { %v2275_v58 = vpop.eup %2274 }
 0xa54   :  { %v1101_v59 = vmul.f32 %v2275_v58, %v1098_v57  ;;  %vm1107_vm12 = vweird.f32 %v2275_v58 }
 0xa55   :  { %vm1108_vm14 = vmor %vm1106_vm13, %vm1107_vm12 }
 0xa56   :  { %v1102_v60 = vmul.f32 %v2275_v58, %v1101_v59 }
 0xa58   :  { %v1103_v61 = vmul.f32 0.5, %v1102_v60 }
 0xa5a   :  { %v1104_v62 = vsub.f32 1.5, %v1103_v61 }
 0xa5c   :  { %v1105_v63 = vmul.f32 %v2275_v58, %v1104_v62 }
 0xa5e   :  { %v1109_v1 = vsel %vm1108_vm14, %v2275_v58, %v1105_v63 }
 0xa5f   :  { %v1120_v2 = vmul.f32 %v1109_v1, %v1086_v15 }
 0xa61   :  { %v1125_v3 = vmul.f32 %v2225_v0, %v1120_v2 }
 0xa63   :  { %v2935_v4 = vadd.f32 %v2226_v20, %v1125_v3 }
 0xa65   :  { %2139 = vmatmul.msk.f32.vlgmr.msra.gmra.mxu2 %vm249_vm2, %v2935_v4 }
 0xaa5   :  { %v1095_v5 = vpop.xlane.xlu0 %1094 }
 0xaa6   :  { %v1097_v6 = vmul.f32 %v1095_v5, %v2868_v40 }
 0xaa8   :  { %v1099_v7 = vadd.f32 1e-05, %v1097_v6  ;;  %v2141_v6 = vld [vmem:[%s3145_s6 + $0x20] sm:$0xff] }
 0xaaa   :  { %2276 = vrsqrt.f32 %v1099_v7  ;;  %vm1116_vm0 = vweird.f32 %v1099_v7 }
 0xab0   :  { %v2277_v8 = vpop.eup %2276 }
 0xab1   :  { %v1111_v9 = vmul.f32 %v2277_v8, %v1099_v7  ;;  %vm1117_vm15 = vweird.f32 %v2277_v8  ;;  %v2142_v7 = vld [vmem:[%s3145_s6 + $0x28] sm:$0xff] }
 0xab2   :  { %vm1118_vm1 = vmor %vm1116_vm0, %vm1117_vm15  ;;  %vm2058_vm0 = vcmask 1041409  }
 0xab3   :  { %v1112_v10 = vmul.f32 %v2277_v8, %v1111_v9 }
 0xab5   :  { %v1113_v11 = vmul.f32 0.5, %v1112_v10 }
 0xab7   :  { %v1114_v13 = vsub.f32 1.5, %v1113_v11 }
 0xab9   :  { %v1115_v14 = vmul.f32 %v2277_v8, %v1114_v13 }
 0xabb   :  { %v1119_v16 = vsel %vm1118_vm1, %v2277_v8, %v1115_v14  ;;  %vm2082_vm1 = vcmask 1024  }
 0xabc   :  { %v1121_v17 = vmul.f32 %v1119_v16, %v1087_v49 }
 0xabe   :  { %v1126_v19 = vmul.f32 %v2225_v0, %v1121_v17 }
 0xac0   :  { %v2940_v21 = vadd.f32 %v2226_v20, %v1126_v19 }
 0xac2   :  { %2140 = vmatmul.msk.f32.gmra.mxu2 %vm249_vm2, %v2940_v21 }
 0xae8   :  { %v1165_v23 = vpop.f32.mrf.mxu2 }
 0xae9   :  { %v2947_v24 = vadd.f32 %v2227_v22, %v1165_v23 }
 0xaeb   :  { %1306 = vrot.lane.b32.xlu2 %v2947_v24, %s2557_s9  ;;  %1177 = vrot.lane.b32.xlu1 %v2947_v24, %s2558_s1 }
 0xaec   :  { %1304 = vrot.lane.b32.xlu0 %v2947_v24, %s2559_s20 }
 0xb45   :  { %v1168_v25 = vpop.f32.mrf.mxu2  ;;  %v1307_v29 = vpop.permute.xlu2 %1306 }
 0xb46   :  { %v2955_v26 = vadd.f32 %v2227_v22, %v1168_v25 }
 0xb48   :  { %1204 = vrot.lane.b32.xlu0 %v2955_v26, %s2558_s1 }
 0xb50   :  { %1334 = vrot.lane.b32.xlu0 %v2955_v26, %s2557_s9 }
 0xb58   :  { %1332 = vrot.lane.b32.xlu0 %v2955_v26, %s2559_s20 }
 0xb5d   :  { %v1178_v27 = vpop.permute.xlu1 %1177 }
 0xb5e   :  { %2145 = vmatpush.xpose.msk.msrb.mxu3 %vm286_vm3, %v1178_v27  ;;  %v1305_v31 = vpop.permute.xlu0 %1304 }
 0xb61   :  { %2146 = vmatmul.msk.f32.vlgmr.msrb.gmra.mxu3 %vm286_vm3, %v2947_v24 }
 0xb62   :  { %2151 = vmatpush.xpose.msk.msra.mxu3 %vm286_vm3, %v1307_v29 }
 0xb66   :  { %1455 = vmatpush.msrb.mxu3 %v2142_v7 }
 0xb69   :  { %2152 = vmatmul.msk.f32.vlgmr.msra.gmra.mxu3 %vm286_vm3, %v1305_v31 }
 0xbba   :  { %v1205_v32 = vpop.permute.xlu0 %1204 }
 0xbbb   :  { %2147 = vmatpush.xpose.msk.msra.mxu1 %vm286_vm3, %v1205_v32 }
 0xbbe   :  { %2148 = vmatmul.msk.f32.vlgmr.msra.gmra.mxu1 %vm286_vm3, %v2955_v26 }
 0xbc2   :  { %v1335_v33 = vpop.permute.xlu0 %1334 }
 0xbc3   :  { %2153 = vmatpush.xpose.msk.msrb.mxu1 %vm286_vm3, %v1335_v33 }
 0xbc7   :  { %1484 = vmatpush.msra.mxu1 %v2141_v6 }
 0xbca   :  { %v1333_v34 = vpop.permute.xlu0 %1332 }
 0xbcb   :  { %2154 = vmatmul.msk.f32.vlgmr.msrb.gmra.mxu1 %vm286_vm3, %v1333_v34 }
 0xbe4   :  { %v1200_v28 = vpop.f32.mrf.mxu3 }
 0xbe5   :  { %v1230_v35 = vsel %vm286_vm3, %v1200_v28, -inf }
 0xbe6   :  { %1231 = vmax.xlane.f32.xlu2 %v1230_v35 }
 0xbec   :  { %v1329_v36 = vpop.f32.mrf.mxu3 }
 0xbed   :  { %v1360_v37 = vsel %vm286_vm3, %v1329_v36, -inf }
 0xbee   :  { %1361 = vmax.xlane.f32.xlu1 %v1360_v37 }
 0xc07   :  { %1252 = vrot.lane.b32.xlu1 %v2947_v24, %s2560_s21 }
 0xc0f   :  { %1492 = vrot.lane.b32.xlu1 %v2947_v24, %s2561_s13 }
 0xc3b   :  { %v1227_v47 = vpop.f32.mrf.mxu1 }
 0xc3c   :  { %v1233_v50 = vsel %vm286_vm3, %v1227_v47, -inf }
 0xc48   :  { %v1357_v48 = vpop.f32.mrf.mxu1 }
 0xc49   :  { %v1363_v49 = vsel %vm286_vm3, %v1357_v48, -inf }
 0xc59   :  { %v1232_v12 = vpop.xlane.xlu2 %1231 }
 0xc5a   :  { %v1236_v38 = vsub.f32 %v1200_v28, %v1232_v12 }
 0xc5c   :  { %v1238_v39 = vmul.f32 1.442695, %v1236_v38 }
 0xc5e   :  { %2278 = vpow2.f32 %v1238_v39 }
 0xc61   :  { %v1362_v30 = vpop.xlane.xlu1 %1361 }
 0xc62   :  { %v1366_v41 = vsub.f32 %v1329_v36, %v1362_v30 }
 0xc64   :  { %v2279_v42 = vpop.eup %2278  ;;  %v1368_v43 = vmul.f32 1.442695, %v1366_v41 }
 0xc65   :  { %v1242_v44 = vsel %vm286_vm3, %v2279_v42, 0.0 }
 0xc66   :  { %2280 = vpow2.f32 %v1368_v43  ;;  %1243 = vadd.xlane.f32.xlu0 %v1242_v44 }
 0xc6c   :  { %v2281_v15 = vpop.eup %2280 }
 0xc6d   :  { %v1372_v45 = vsel %vm286_vm3, %v2281_v15, 0.0 }
 0xc6e   :  { %1373 = vadd.xlane.f32.xlu2 %v1372_v45 }
 0xc79   :  { %v1253_v46 = vpop.permute.xlu1 %1252 }
 0xc7a   :  { %1273 = vmatpush.msrb.mxu0 %v1253_v46  ;;  %1494 = vrot.lane.b32.xlu0 %v2947_v24, %s2563_s15 }
 0xc81   :  { %v1493_v58 = vpop.permute.xlu1 %1492 }
 0xc82   :  { %1278 = vrot.lane.b32.xlu0 %v2955_v26, %s2560_s21 }
 0xc86   :  { %1382 = vrot.lane.b32.xlu2 %v2947_v24, %s2562_s14 }
 0xcac   :  { %1364 = vmax.xlane.f32.xlu0 %v1363_v49 }
 0xcaf   :  { %1234 = vmax.xlane.f32.xlu2 %v1233_v50 }
 0xcc0   :  { %1520 = vrot.lane.b32.xlu0 %v2955_v26, %s2561_s13 }
 0xcc8   :  { %1653 = vrot.lane.b32.xlu0 %v2947_v24, %s2565_s23 }
 0xcd0   :  { %1683 = vrot.lane.b32.xlu0 %v2955_v26, %s2564_s22 }
 0xcd9   :  { %v1244_v51 = vpop.xlane.xlu0 %1243 }
 0xcda   :  { %2282 = vrcp.f32 %v1244_v51 }
 0xce0   :  { %v2283_v52 = vpop.eup %2282 }
 0xce1   :  { %v1250_v53 = vmul.f32 %v2283_v52, %v2279_v42  ;;  %v1374_v18 = vpop.xlane.xlu2 %1373 }
 0xce2   :  { %2284 = vrcp.f32 %v1374_v18 }
 0xce3   :  { %2149 = vmatmul.msk.f32.vlgmr.msrb.gmra.mxu0 %vm286_vm3, %v1250_v53 }
 0xce8   :  { %v2285_v54 = vpop.eup %2284 }
 0xce9   :  { %v1380_v55 = vmul.f32 %v2285_v54, %v2281_v15  ;;  %v1383_v56 = vpop.permute.xlu2 %1382 }
 0xcea   :  { %1403 = vmatpush.msra.mxu0 %v1383_v56 }
 0xceb   :  { %2155 = vmatmul.msk.f32.vlgmr.msra.gmra.mxu0 %vm286_vm3, %v1380_v55 }
 0xcec   :  { %v1495_v57 = vpop.permute.xlu0 %1494 }
 0xced   :  { %2161 = vmatpush.xpose.msk.msrb.mxu0 %vm286_vm3, %v1495_v57 }
 0xcf3   :  { %2162 = vmatmul.msk.f32.vlgmr.msrb.gmra.mxu0 %vm286_vm3, %v1493_v58 }
 0xcf4   :  { %v1279_v59 = vpop.permute.xlu0 %1278 }
 0xcf5   :  { %1299 = vmatpush.msrb.mxu2 %v1279_v59 }
 0xd1f   :  { %v1365_v60 = vpop.xlane.xlu0 %1364 }
 0xd20   :  { %v1367_v63 = vsub.f32 %v1357_v48, %v1365_v60  ;;  %v2143_v48 = vld [vmem:[%s3145_s6 + $0x30] sm:$0xff] }
 0xd21   :  { %1643 = vmatpush.msra.mxu3 %v2143_v48 }
 0xd22   :  { %v1235_v61 = vpop.xlane.xlu2 %1234  ;;  %v1370_v1 = vmul.f32 1.442695, %v1367_v63 }
 0xd23   :  { %v1237_v62 = vsub.f32 %v1227_v47, %v1235_v61 }
 0xd25   :  { %v1240_v0 = vmul.f32 1.442695, %v1237_v62 }
 0xd27   :  { %2286 = vpow2.f32 %v1240_v0 }
 0xd28   :  { %2288 = vpow2.f32 %v1370_v1 }
 0xd2d   :  { %v2287_v2 = vpop.eup %2286 }
 0xd2e   :  { %v1245_v20 = vsel %vm286_vm3, %v2287_v2, 0.0  ;;  %v2289_v3 = vpop.eup %2288 }
 0xd2f   :  { %1246 = vadd.xlane.f32.xlu1 %v1245_v20  ;;  %v1375_v5 = vsel %vm286_vm3, %v2289_v3, 0.0 }
 0xd32   :  { %v1521_v19 = vpop.permute.xlu0 %1520 }
 0xd37   :  { %1376 = vadd.xlane.f32.xlu1 %v1375_v5 }
 0xd3a   :  { %v1654_v23 = vpop.permute.xlu0 %1653 }
 0xd42   :  { %v1684_v29 = vpop.permute.xlu0 %1683 }
 0xd50   :  { %1522 = vrot.lane.b32.xlu1 %v2955_v26, %s2563_s15 }
 0xd58   :  { %1655 = vrot.lane.b32.xlu1 %v2947_v24, %s2564_s22 }
 0xd60   :  { %v1275_v8 = vpop.f32.mrf.mxu0  ;;  %1570 = vrot.lane.b32.xlu1 %v2947_v24, %s2566_s26 }
 0xd61   :  { %2159 = vmatmul.msk.f32.vlgmr.msra.gmra.mxu1 %vm286_vm3, %v1275_v8 }
 0xd68   :  { %v1405_v9 = vpop.f32.mrf.mxu0  ;;  %1681 = vrot.lane.b32.xlu1 %v2955_v26, %s2565_s23 }
 0xd69   :  { %2157 = vmatmul.msk.f32.vlgmr.msrb.gmra.mxu3 %vm286_vm3, %v1405_v9 }
 0xd70   :  { %v1517_v10 = vpop.f32.mrf.mxu0 }
 0xd71   :  { %v1548_v11 = vsel %vm286_vm3, %v1517_v10, -inf }
 0xd72   :  { %1549 = vmax.xlane.f32.xlu2 %v1548_v11 }
 0xd8a   :  { %1408 = vrot.lane.b32.xlu2 %v2955_v26, %s2562_s14 }
 0xda2   :  { %v1247_v13 = vpop.xlane.xlu1 %1246 }
 0xda3   :  { %2290 = vrcp.f32 %v1247_v13 }
 0xda9   :  { %v2291_v14 = vpop.eup %2290 }
 0xdaa   :  { %v1251_v16 = vmul.f32 %v2291_v14, %v2287_v2  ;;  %v1377_v17 = vpop.xlane.xlu1 %1376 }
 0xdab   :  { %2292 = vrcp.f32 %v1377_v17 }
 0xdac   :  { %2150 = vmatmul.msk.f32.vlgmr.msrb.gmra.mxu2 %vm286_vm3, %v1251_v16 }
 0xdb1   :  { %v2293_v34 = vpop.eup %2292 }
 0xdb2   :  { %v1381_v28 = vmul.f32 %v2293_v34, %v2289_v3 }
 0xdc2   :  { %v1523_v22 = vpop.permute.xlu1 %1522 }
 0xdca   :  { %v1656_v25 = vpop.permute.xlu1 %1655 }
 0xdcb   :  { %2169 = vmatpush.xpose.msk.msrb.mxu1 %vm286_vm3, %v1656_v25 }
 0xdd2   :  { %v1571_v27 = vpop.permute.xlu1 %1570 }
 0xdd3   :  { %1591 = vmatpush.msra.mxu0 %v1571_v27 }
 0xdd5   :  { %2171 = vmatpush.xpose.msk.msrb.mxu0 %vm286_vm3, %v1684_v29  ;;  %v2228_v29 = vld [vmem:[#allocation7 + $0x1] ss:$0 sm:$0xff] }
 0xdda   :  { %v1682_v42 = vpop.permute.xlu1 %1681 }
 0xdde   :  { %v3035_v15 = vpop.f32.mrf.mxu1 }
 0xde5   :  { %v1550_v31 = vpop.xlane.xlu2 %1549 }
 0xde6   :  { %v1554_v32 = vsub.f32 %v1517_v10, %v1550_v31 }
 0xde8   :  { %v1556_v33 = vmul.f32 1.442695, %v1554_v32 }
 0xdea   :  { %2294 = vpow2.f32 %v1556_v33 }
 0xded   :  { %v1409_v35 = vpop.permute.xlu2 %1408 }
 0xdee   :  { %1429 = vmatpush.msra.mxu2 %v1409_v35 }
 0xdef   :  { %2156 = vmatmul.msk.f32.vlgmr.msra.gmra.mxu2 %vm286_vm3, %v1381_v28 }
 0xdf0   :  { %v2295_v36 = vpop.eup %2294  ;;  %2163 = vmatpush.xpose.msk.msrb.mxu2 %vm286_vm3, %v1523_v22 }
 0xdf1   :  { %v1560_v37 = vsel %vm286_vm3, %v2295_v36, 0.0 }
 0xdf2   :  { %1561 = vadd.xlane.f32.xlu2 %v1560_v37 }
 0xdf7   :  { %2164 = vmatmul.msk.f32.vlgmr.msrb.gmra.mxu2 %vm286_vm3, %v1521_v19  ;;  %v1457_v19 = vpop.f32.mrf.mxu3 }
 0xdf8   :  { %v1487_v25 = vadd.f32 %v3035_v15, %v1457_v19 }
 0xe2f   :  { %v1301_v12 = vpop.f32.mrf.mxu2 }
 0xe30   :  { %2160 = vmatmul.msk.f32.gmra.mxu1 %vm286_vm3, %v1301_v12 }
 0xe38   :  { %2170 = vmatmul.msk.f32.vlgmr.msrb.gmra.mxu1 %vm286_vm3, %v1654_v23 }
 0xe65   :  { %v1562_v38 = vpop.xlane.xlu2 %1561 }
 0xe66   :  { %2296 = vrcp.f32 %v1562_v38 }
 0xe6c   :  { %v2297_v39 = vpop.eup %2296 }
 0xe6d   :  { %v1568_v30 = vmul.f32 %v2297_v39, %v2295_v36 }
 0xe6f   :  { %2165 = vmatmul.msk.f32.vlgmr.msra.gmra.mxu0 %vm286_vm3, %v1568_v30 }
 0xe72   :  { %v1431_v41 = vpop.f32.mrf.mxu2 }
 0xe73   :  { %2158 = vmatmul.msk.f32.gmra.mxu3 %vm286_vm3, %v1431_v41 }
 0xe77   :  { %2172 = vmatmul.msk.f32.vlgmr.msrb.gmra.mxu0 %vm286_vm3, %v1682_v42 }
 0xe7a   :  { %v1545_v43 = vpop.f32.mrf.mxu2 }
 0xe7b   :  { %v1551_v44 = vsel %vm286_vm3, %v1545_v43, -inf }
 0xe7c   :  { %1552 = vmax.xlane.f32.xlu0 %v1551_v44 }
 0xe90   :  { %1596 = vrot.lane.b32.xlu0 %v2955_v26, %s2566_s26 }
 0xead   :  { %v3037_v45 = vpop.f32.mrf.mxu1 }
 0xeb5   :  { %v1678_v46 = vpop.f32.mrf.mxu1 }
 0xeb6   :  { %v1709_v47 = vsel %vm286_vm3, %v1678_v46, -inf }
 0xeb7   :  { %1710 = vmax.xlane.f32.xlu1 %v1709_v47 }
 0xeec   :  { %v1593_v49 = vpop.f32.mrf.mxu0 }
 0xeed   :  { %2167 = vmatmul.msk.f32.vlgmr.msra.gmra.mxu3 %vm286_vm3, %v1593_v49 }
 0xeef   :  { %v1553_v50 = vpop.xlane.xlu0 %1552 }
 0xef0   :  { %v1555_v51 = vsub.f32 %v1545_v43, %v1553_v50  ;;  %v2179_v50 = vld [vmem:[%s3149_s10 + $0x30] sm:$0xff] }
 0xef2   :  { %v1558_v52 = vmul.f32 1.442695, %v1555_v51  ;;  %v2178_v51 = vld [vmem:[%s3149_s10 + $0x28] sm:$0xff] }
 0xef4   :  { %2298 = vpow2.f32 %v1558_v52  ;;  %v1706_v54 = vpop.f32.mrf.mxu0  ;;  %v2177_v52 = vld [vmem:[%s3149_s10 + $0x20] sm:$0xff] }
 0xef5   :  { %v1712_v56 = vsel %vm286_vm3, %v1706_v54, -inf }
 0xef6   :  { %v1460_v22 = vpop.f32.mrf.mxu3 }
 0xef7   :  { %v1490_v36 = vadd.f32 %v3037_v45, %v1460_v22 }
 0xefa   :  { %v2299_v53 = vpop.eup %2298 }
 0xefb   :  { %v1563_v18 = vsel %vm286_vm3, %v2299_v53, 0.0 }
 0xefc   :  { %1564 = vadd.xlane.f32.xlu2 %v1563_v18 }
 0xf02   :  { %v1597_v55 = vpop.permute.xlu0 %1596 }
 0xf03   :  { %1617 = vmatpush.msra.mxu2 %v1597_v55 }
 0xf04   :  { %1713 = vmax.xlane.f32.xlu2 %v1712_v56 }
 0xf2a   :  { %v1711_v57 = vpop.xlane.xlu1 %1710 }
 0xf2b   :  { %v1715_v58 = vsub.f32 %v1678_v46, %v1711_v57 }
 0xf2d   :  { %v1717_v59 = vmul.f32 1.442695, %v1715_v58 }
 0xf2f   :  { %2300 = vpow2.f32 %v1717_v59 }
 0xf35   :  { %v2301_v60 = vpop.eup %2300 }
 0xf36   :  { %v1721_v61 = vsel %vm286_vm3, %v2301_v60, 0.0 }
 0xf37   :  { %1722 = vadd.xlane.f32.xlu2 %v1721_v61  ;;  %v2229_v61 = vld [vmem:[#allocation8 + $0x1] ss:$0 sm:$0xff] }
 0xf4f   :  { %1731 = vrot.lane.b32.xlu2 %v2947_v24, %s2567_s25 }
 0xf6f   :  { %v1565_v62 = vpop.xlane.xlu2 %1564 }
 0xf70   :  { %2302 = vrcp.f32 %v1565_v62  ;;  %v1645_v23 = vpop.f32.mrf.mxu3 }
 0xf71   :  { %v1651_v27 = vadd.f32 %v1645_v23, %v1487_v25  ;;  %v2185_v25 = vld [vmem:[%s3151_s12 + $0x50] sm:$0xff] }
 0xf76   :  { %v2303_v63 = vpop.eup %2302 }
 0xf77   :  { %v1569_v0 = vmul.f32 %v2303_v63, %v2299_v53  ;;  %v1714_v1 = vpop.xlane.xlu2 %1713 }
 0xf78   :  { %v1716_v2 = vsub.f32 %v1706_v54, %v1714_v1 }
 0xf79   :  { %2166 = vmatmul.msk.f32.vlgmr.msra.gmra.mxu2 %vm286_vm3, %v1569_v0  ;;  %v2230_v0 = vld [vmem:[#allocation10 + $0x1] ss:$0 sm:$0xff] }
 0xf7a   :  { %v1719_v20 = vmul.f32 1.442695, %v1716_v2 }
 0xf7c   :  { %2304 = vpow2.f32 %v1719_v20  ;;  %v2190_v20 = vld [vmem:[%s3151_s12 + $0x78] sm:$0xff] }
 0xf7d   :  { %1950 = vmatpush.msrb.mxu3 %v2190_v20  ;;  %v2233_v20 = vld [vmem:[#allocation14 + $0x1] ss:$0 sm:$0xff] }
 0xf82   :  { %v2305_v3 = vpop.eup %2304 }
 0xf83   :  { %v1724_v5 = vsel %vm286_vm3, %v2305_v3, 0.0 }
 0xf84   :  { %1725 = vadd.xlane.f32.xlu1 %v1724_v5  ;;  %v2188_v5 = vld [vmem:[%s3151_s12 + $0x68] sm:$0xff] }
 0xf9d   :  { %1757 = vrot.lane.b32.xlu1 %v2955_v26, %s2567_s25  ;;  %v2144_v26 = vld [vmem:[%s3145_s6 + $0x38] sm:$0xff] }
 0xf9e   :  { %1804 = vmatpush.msra.mxu0 %v2144_v26 }
 0xfaa   :  { %v1723_v6 = vpop.xlane.xlu2 %1722 }
 0xfab   :  { %2306 = vrcp.f32 %v1723_v6 }
 0xfb1   :  { %v2307_v24 = vpop.eup %2306 }
 0xfb2   :  { %v1729_v7 = vmul.f32 %v2307_v24, %v2301_v60  ;;  %v1732_v8 = vpop.permute.xlu2 %1731 }
 0xfb3   :  { %1752 = vmatpush.msrb.mxu2 %v1732_v8 }
 0xfb4   :  { %2173 = vmatmul.msk.f32.vlgmr.msrb.gmra.mxu2 %vm286_vm3, %v1729_v7  ;;  %v2187_v7 = vld [vmem:[%s3151_s12 + $0x60] sm:$0xff] }
 0xff7   :  { %v1726_v10 = vpop.xlane.xlu1 %1725 }
 0xff8   :  { %2308 = vrcp.f32 %v1726_v10 }
 0xffc   :  { %v1619_v9 = vpop.f32.mrf.mxu2 }
 0xffd   :  { %2168 = vmatmul.msk.f32.gmra.mxu3 %vm286_vm3, %v1619_v9  ;;  %v2186_v9 = vld [vmem:[%s3151_s12 + $0x58] sm:$0xff] }
 0xffe   :  { %v2309_v11 = vpop.eup %2308 }
 0xfff   :  { %v1730_v13 = vmul.f32 %v2309_v11, %v2305_v3  ;;  %v2189_v3 = vld [vmem:[%s3151_s12 + $0x70] sm:$0xff] }
0x1000   :  { %1951 = vmatpush.msrb.mxu3 %v2189_v3 }
0x1002   :  { %1952 = vmatpush.msrb.mxu3 %v2188_v5 }
0x1004   :  { %1953 = vmatpush.msrb.mxu3 %v2187_v7 }
0x1006   :  { %1954 = vmatpush.msrb.mxu3 %v2186_v9 }
0x1008   :  { %1955 = vmatpush.msrb.mxu3 %v2185_v25 }
0x100f   :  { %v1758_v14 = vpop.permute.xlu1 %1757 }
0x1010   :  { %1778 = vmatpush.msra.mxu1 %v1758_v14 }
0x1011   :  { %2174 = vmatmul.msk.f32.vlgmr.msra.gmra.mxu1 %vm286_vm3, %v1730_v13 }
0x1037   :  { %v1754_v16 = vpop.f32.mrf.mxu2 }
0x1038   :  { %2175 = vmatmul.msk.f32.vlgmr.msra.gmra.mxu0 %vm286_vm3, %v1754_v16 }
0x1080   :  { %v1648_v35 = vpop.f32.mrf.mxu3 }
0x1081   :  { %v1652_v37 = vadd.f32 %v1648_v35, %v1490_v36 }
0x108e   :  { %v1780_v17 = vpop.f32.mrf.mxu1 }
0x108f   :  { %2176 = vmatmul.msk.f32.gmra.mxu0 %vm286_vm3, %v1780_v17 }
0x10b5   :  { %v1806_v31 = vpop.f32.mrf.mxu0 }
0x10b6   :  { %v1812_v32 = vadd.f32 %v1806_v31, %v1651_v27  ;;  %v2184_v27 = vld [vmem:[%s3151_s12 + $0x48] sm:$0xff]  ;;  %v2231_v31 = vld [vmem:[#allocation11 + $0x1] ss:$0 sm:$0xff] }
0x10b7   :  { %1956 = vmatpush.msrb.mxu3 %v2184_v27 }
0x10b8   :  { %v1819_v33 = vadd.f32 %v2228_v29, %v1812_v32 }
0x10ba   :  { %v1821_v34 = vadd.f32 %v1819_v33, %v2935_v4 }
0x10bc   :  { %v1827_v28 = vsel %vm249_vm2, %v1821_v34, 0.0 }
0x10bd   :  { %1828 = vadd.xlane.f32.xlu0 %v1827_v28 }
0x110c   :  { %v1809_v12 = vpop.f32.mrf.mxu0 }
0x110d   :  { %v1813_v38 = vadd.f32 %v1809_v12, %v1652_v37  ;;  %v2232_v37 = vld [vmem:[#allocation13 + $0x1] ss:$0 sm:$0xff] }
0x110f   :  { %v1820_v39 = vadd.f32 %v2228_v29, %v1813_v38  ;;  %v2183_v29 = vld [vmem:[%s3151_s12 + $0x40] sm:$0xff] }
0x1110   :  { %1957 = vmatpush.msrb.mxu3 %v2183_v29 }
0x1111   :  { %v1822_v30 = vadd.f32 %v1820_v39, %v2940_v21  ;;  %v2180_v21 = vld [vmem:[%s3149_s10 + $0x38] sm:$0xff] }
0x1112   :  { %1909 = vmatpush.msra.mxu2 %v2180_v21 }
0x1113   :  { %v1830_v41 = vsel %vm249_vm2, %v1822_v30, 0.0 }
0x1114   :  { %1831 = vadd.xlane.f32.xlu2 %v1830_v41  ;;  %1910 = vmatpush.msra.mxu2 %v2179_v50 }
0x1116   :  { %1911 = vmatpush.msra.mxu2 %v2178_v51 }
0x1118   :  { %1912 = vmatpush.msra.mxu2 %v2177_v52 }
0x1130   :  { %v1829_v42 = vpop.xlane.xlu0 %1828 }
0x1131   :  { %v1833_v43 = vmul.f32 %v1829_v42, %v2868_v40 }
0x1133   :  { %v1835_v44 = vsub.f32 %v1821_v34, %v1833_v43 }
0x1135   :  { %v1837_v4 = vmul.f32 %v1835_v44, %v1835_v44 }
0x1137   :  { %v1839_v15 = vsel %vm249_vm2, %v1837_v4, 0.0 }
0x1138   :  { %1840 = vadd.xlane.f32.xlu1 %v1839_v15 }
0x1187   :  { %v1832_v46 = vpop.xlane.xlu2 %1831 }
0x1188   :  { %v1834_v45 = vmul.f32 %v1832_v46, %v2868_v40 }
0x118a   :  { %v1836_v47 = vsub.f32 %v1822_v30, %v1834_v45 }
0x118c   :  { %v1838_v48 = vmul.f32 %v1836_v47, %v1836_v47 }
0x118e   :  { %v1842_v49 = vsel %vm249_vm2, %v1838_v48, 0.0 }
0x118f   :  { %1843 = vadd.xlane.f32.xlu0 %v1842_v49 }
0x11ab   :  { %v1841_v53 = vpop.xlane.xlu1 %1840 }
0x11ac   :  { %v1845_v18 = vmul.f32 %v1841_v53, %v2868_v40 }
0x11ae   :  { %v1847_v54 = vadd.f32 1e-05, %v1845_v18 }
0x11b0   :  { %2310 = vrsqrt.f32 %v1847_v54  ;;  %vm1855_vm4 = vweird.f32 %v1847_v54 }
0x11b6   :  { %v2311_v55 = vpop.eup %2310 }
0x11b7   :  { %v1850_v56 = vmul.f32 %v2311_v55, %v1847_v54  ;;  %vm1856_vm3 = vweird.f32 %v2311_v55 }
0x11b8   :  { %vm1857_vm5 = vmor %vm1855_vm4, %vm1856_vm3 }
0x11b9   :  { %v1851_v57 = vmul.f32 %v2311_v55, %v1850_v56 }
0x11bb   :  { %v1852_v58 = vmul.f32 0.5, %v1851_v57 }
0x11bd   :  { %v1853_v59 = vsub.f32 1.5, %v1852_v58 }
0x11bf   :  { %v1854_v60 = vmul.f32 %v2311_v55, %v1853_v59 }
0x11c1   :  { %v1858_v62 = vsel %vm1857_vm5, %v2311_v55, %v1854_v60  ;;  %v2051_v60 = vld [vmem:[%s3155_s16 + $0x18] sm:$0xff] }
0x11c2   :  { %v1869_v63 = vmul.f32 %v1858_v62, %v1835_v44  ;;  %2074 = vmatpush.msrb.mxu1 %v2051_v60 }
0x11c4   :  { %v1874_v1 = vmul.f32 %v2229_v61, %v1869_v63 }
0x11c6   :  { %v1879_v2 = vadd.f32 %v2230_v0, %v1874_v1 }
0x11c8   :  { %2181 = vmatmul.msk.f32.vlgmr.msra.gmra.mxu2 %vm249_vm2, %v1879_v2 }
0x1202   :  { %v1844_v6 = vpop.xlane.xlu0 %1843 }
0x1203   :  { %v1846_v24 = vmul.f32 %v1844_v6, %v2868_v40  ;;  %v2234_v6 = vld [vmem:[#allocation16 + $0x1] ss:$0 sm:$0xff] }
0x1205   :  { %v1848_v8 = vadd.f32 1e-05, %v1846_v24 }
0x1207   :  { %2312 = vrsqrt.f32 %v1848_v8  ;;  %vm1865_vm7 = vweird.f32 %v1848_v8 }
0x120d   :  { %v2313_v10 = vpop.eup %2312 }
0x120e   :  { %v1860_v11 = vmul.f32 %v2313_v10, %v1848_v8  ;;  %vm1866_vm6 = vweird.f32 %v2313_v10 }
0x120f   :  { %vm1867_vm8 = vmor %vm1865_vm7, %vm1866_vm6 }
0x1210   :  { %v1861_v13 = vmul.f32 %v2313_v10, %v1860_v11  ;;  %v2569_v11 = vmov 8.0  }
0x1212   :  { %v1862_v14 = vmul.f32 0.5, %v1861_v13 }
0x1214   :  { %v1863_v26 = vsub.f32 1.5, %v1862_v14 }
0x1216   :  { %v1864_v16 = vmul.f32 %v2313_v10, %v1863_v26 }
0x1218   :  { %v1868_v17 = vsel %vm1867_vm8, %v2313_v10, %v1864_v16 }
0x1219   :  { %v1870_v19 = vmul.f32 %v1868_v17, %v1836_v47 }
0x121b   :  { %v1875_v22 = vmul.f32 %v2229_v61, %v1870_v19  ;;  %v2050_v61 = vld [vmem:[%s3155_s16 + $0x10] sm:$0xff] }
0x121c   :  { %2075 = vmatpush.msrb.mxu1 %v2050_v61 }
0x121d   :  { %v1880_v23 = vadd.f32 %v2230_v0, %v1875_v22  ;;  %v2049_v0 = vld [vmem:[%s3155_s16 + $0x8] sm:$0xff] }
0x121e   :  { %2076 = vmatpush.msrb.mxu1 %v2049_v0 }
0x121f   :  { %2182 = vmatmul.msk.f32.gmra.mxu2 %vm249_vm2, %v1880_v23 }
0x124b   :  { %v1914_v32 = vpop.f32.mrf.mxu2 }
0x124c   :  { %v1915_v33 = vadd.f32 %v2231_v31, %v1914_v32 }
0x124e   :  { %v1920_v34 = vmax.f32 %v1915_v33, 0.0 }
0x1250   :  { %2191 = vmatmul.msk.f32.vlgmr.msrb.gmra.mxu3 %vm1044_vm11, %v1920_v34 }
0x12a2   :  { %v1917_v28 = vpop.f32.mrf.mxu2 }
0x12a3   :  { %v1918_v35 = vadd.f32 %v2231_v31, %v1917_v28 }
0x12a5   :  { %v1921_v36 = vmax.f32 %v1918_v35, 0.0 }
0x12a7   :  { %2192 = vmatmul.msk.f32.gmra.mxu3 %vm1044_vm11, %v1921_v36 }
0x12d3   :  { %v1959_v12 = vpop.f32.mrf.mxu3 }
0x12d4   :  { %v1960_v38 = vadd.f32 %v2232_v37, %v1959_v12 }
0x12d6   :  { %v1965_v39 = vadd.f32 %v1960_v38, %v1879_v2  ;;  %v2048_v2 = vld [vmem:[%s3155_s16] sm:$0xff] }
0x12d7   :  { %2077 = vmatpush.msrb.mxu1 %v2048_v2 }
0x12d8   :  { %v1971_v30 = vsel %vm249_vm2, %v1965_v39, 0.0 }
0x12d9   :  { %1972 = vadd.xlane.f32.xlu2 %v1971_v30 }
0x132a   :  { %v1962_v41 = vpop.f32.mrf.mxu3 }
0x132b   :  { %v1963_v42 = vadd.f32 %v2232_v37, %v1962_v41 }
0x132d   :  { %v1966_v43 = vadd.f32 %v1963_v42, %v1880_v23 }
0x132f   :  { %v1974_v44 = vsel %vm249_vm2, %v1966_v43, 0.0 }
0x1330   :  { %1975 = vadd.xlane.f32.xlu0 %v1974_v44 }
0x134c   :  { %v1973_v4 = vpop.xlane.xlu2 %1972 }
0x134d   :  { %v1977_v15 = vmul.f32 %v1973_v4, %v2868_v40 }
0x134f   :  { %v1979_v46 = vsub.f32 %v1965_v39, %v1977_v15 }
0x1351   :  { %v1981_v45 = vmul.f32 %v1979_v46, %v1979_v46 }
0x1353   :  { %v1983_v47 = vsel %vm249_vm2, %v1981_v45, 0.0 }
0x1354   :  { %1984 = vadd.xlane.f32.xlu2 %v1983_v47 }
0x13a3   :  { %v1976_v48 = vpop.xlane.xlu0 %1975 }
0x13a4   :  { %v1978_v49 = vmul.f32 %v1976_v48, %v2868_v40 }
0x13a6   :  { %v1980_v21 = vsub.f32 %v1966_v43, %v1978_v49 }
0x13a8   :  { %v1982_v50 = vmul.f32 %v1980_v21, %v1980_v21 }
0x13aa   :  { %v1986_v51 = vsel %vm249_vm2, %v1982_v50, 0.0 }
0x13ab   :  { %1987 = vadd.xlane.f32.xlu0 %v1986_v51 }
0x13c7   :  { %v1985_v52 = vpop.xlane.xlu2 %1984 }
0x13c8   :  { %v1989_v53 = vmul.f32 %v1985_v52, %v2868_v40 }
0x13ca   :  { %v1991_v18 = vadd.f32 1e-05, %v1989_v53 }
0x13cc   :  { %2314 = vrsqrt.f32 %v1991_v18  ;;  %vm1999_vm10 = vweird.f32 %v1991_v18 }
0x13d2   :  { %v2315_v54 = vpop.eup %2314 }
0x13d3   :  { %v1994_v55 = vmul.f32 %v2315_v54, %v1991_v18  ;;  %vm2000_vm9 = vweird.f32 %v2315_v54 }
0x13d4   :  { %vm2001_vm11 = vmor %vm1999_vm10, %vm2000_vm9 }
0x13d5   :  { %v1995_v56 = vmul.f32 %v2315_v54, %v1994_v55 }
0x13d7   :  { %v1996_v57 = vmul.f32 0.5, %v1995_v56 }
0x13d9   :  { %v1997_v58 = vsub.f32 1.5, %v1996_v57 }
0x13db   :  { %v1998_v59 = vmul.f32 %v2315_v54, %v1997_v58 }
0x13dd   :  { %v2002_v62 = vsel %vm2001_vm11, %v2315_v54, %v1998_v59 }
0x13de   :  { %v2013_v3 = vmul.f32 %v2002_v62, %v1979_v46  ;;  %v2235_v46 = vld [vmem:[#allocation2] ss:$0 sm:$0xff] }
0x13e0   :  { %v2018_v24 = vmul.f32 %v2233_v20, %v2013_v3 }
0x13e2   :  { %v2023_v8 = vadd.f32 %v2234_v6, %v2018_v24 }
0x141e   :  { %v1988_v63 = vpop.xlane.xlu0 %1987 }
0x141f   :  { %v1990_v1 = vmul.f32 %v1988_v63, %v2868_v40  ;;  %v2025_v40 = vsel %vm249_vm2, %v2023_v8, 0.0 }
0x1420   :  { %v2026_v14 = vrot.slane %v2025_v40, 4 }
0x1421   :  { %v1992_v5 = vadd.f32 1e-05, %v1990_v1 }
0x1422   :  { %v2027_v22 = vadd.f32 %v2026_v14, %v2025_v40 }
0x1423   :  { %2316 = vrsqrt.f32 %v1992_v5  ;;  %vm2009_vm13 = vweird.f32 %v1992_v5 }
0x1424   :  { %2318 = vrcp.f32 %v2569_v11  ;;  %v2028_v29 = vrot.slane %v2027_v22, 2 }
0x1426   :  { %v2029_v28 = vadd.f32 %v2028_v29, %v2027_v22 }
0x1428   :  { %v2030_v37 = vrot.slane %v2029_v28, 1 }
0x1429   :  { %v2317_v7 = vpop.eup %2316 }
0x142a   :  { %v2004_v9 = vmul.f32 %v2317_v7, %v1992_v5  ;;  %vm2010_vm12 = vweird.f32 %v2317_v7  ;;  %v2319_v16 = vpop.eup %2318  ;;  %v2031_v30 = vadd.f32 %v2030_v37, %v2029_v28 }
0x142b   :  { %vm2011_vm14 = vmor %vm2009_vm13, %vm2010_vm12  ;;  %v2040_v25 = vmul.f32 8.0, %v2319_v16  ;;  %vm2044_vm15 = vweird.f32 %v2319_v16 }
0x142c   :  { %v2005_v10 = vmul.f32 %v2317_v7, %v2004_v9 }
0x142d   :  { %v2041_v32 = vsub.f32 1.0, %v2040_v25 }
0x142e   :  { %v2006_v13 = vmul.f32 0.5, %v2005_v10 }
0x142f   :  { %v2042_v35 = vmul.f32 %v2319_v16, %v2041_v32 }
0x1430   :  { %v2007_v26 = vsub.f32 1.5, %v2006_v13 }
0x1431   :  { %v2043_v38 = vadd.f32 %v2319_v16, %v2042_v35 }
0x1432   :  { %v2008_v17 = vmul.f32 %v2317_v7, %v2007_v26 }
0x1433   :  { %v2045_v42 = vsel %vm2044_vm15, %v2319_v16, %v2043_v38 }
0x1434   :  { %v2012_v19 = vsel %vm2011_vm14, %v2317_v7, %v2008_v17  ;;  %v2046_v44 = vmul.f32 %v2045_v42, %v2031_v30 }
0x1435   :  { %v2014_v23 = vmul.f32 %v2012_v19, %v1980_v21 }
0x1437   :  { %v2019_v27 = vmul.f32 %v2233_v20, %v2014_v23 }
0x1439   :  { %v2024_v31 = vadd.f32 %v2234_v6, %v2019_v27 }
0x143b   :  { %v2032_v33 = vsel %vm249_vm2, %v2024_v31, 0.0 }
0x143c   :  { %v2033_v34 = vrot.slane %v2032_v33, 4 }
0x143e   :  { %v2034_v36 = vadd.f32 %v2033_v34, %v2032_v33 }
0x1440   :  { %v2035_v12 = vrot.slane %v2034_v36, 2 }
0x1442   :  { %v2036_v39 = vadd.f32 %v2035_v12, %v2034_v36 }
0x1444   :  { %v2037_v41 = vrot.slane %v2036_v39, 1 }
0x1446   :  { %v2038_v43 = vadd.f32 %v2037_v41, %v2036_v39 }
0x1448   :  { %v2047_v4 = vmul.f32 %v2045_v42, %v2038_v43 }
0x144a   :  { %v2059_v15 = vsel %vm2058_vm0, %v2047_v4, %v2046_v44 }
0x144b   :  { %2193 = vmatmul.msk.f32.vlgmr.msrb.gmra.mxu1 %vm249_vm2, %v2059_v15 }
0x14c8   :  { %v2079_v45 = vpop.f32.mrf.mxu1 }
0x14c9   :  { %v2080_v47 = vadd.f32 %v2235_v46, %v2079_v45 }
0x14cb   :  { %2083 = vst.msk [vmem:[%s3157_s18] sm:$0x3] %vm2082_vm1, %v2080_v47 }
0x14cc   :  { %2088 = vsyncpa [#allocation4], 1 }
0x14cd   :  { %2089 = vsyncpa [#allocation6], 1 }
0x14ce   :  { %2090 = vsyncpa [#allocation9], 1 }
0x14cf   :  { %2091 = vsyncpa [#allocation12], 1 }
0x14d0   :  { %2092 = vsyncpa [#allocation15], 1 }

</bundles_post_ra>
